<compile_context>
chip_gen: v7x
topology: tpu7x:2x2x1
jax: 0.10.0
libtpu: 0.0.40
codegen_flags: <defaults>
</compile_context>

<pallas_src>
import functools

import jax
import jax.numpy as jnp
import numpy as np
from jax.experimental import pallas as pl
from jax.experimental.pallas import tpu as pltpu


def _length_block_kernel(x_ref, ln1_ref, w_attn_ref, w_oproj_ref,
                         ln2_ref, w_a_ref, w_gate_ref, w_mproj_ref,
                         o_ref, y_buf_ref, *, n_head: int, seqs_per_block: int):
    """One grid step = G whole sequences (N = G*L tokens, token-major (N, C))."""
    f32, bf16 = jnp.float32, jnp.bfloat16
    N, C = x_ref.shape
    G = seqs_per_block
    L = N // G
    hd = C // n_head
    eps = 1e-5

    x = x_ref[...].astype(f32)                       # residual kept in f32

    # ---- ln_1 (RMSNorm, f32 element-wise math: v5e-safe) ----
    h = x * jax.lax.rsqrt(jnp.mean(x * x, axis=-1, keepdims=True) + eps)
    h = h * ln1_ref[...]

    # ---- fused QKV projection (bf16 operands, f32 accumulate), bf16 once ----
    # softmax scale (8 / n_embd) is pre-folded into the Q columns of w_attn.
    qkv = jnp.dot(h.astype(bf16), w_attn_ref[...],
                  preferred_element_type=f32).astype(bf16)      # (N, 3C) bf16

    # ---- per-head attention, batched over the G sequences ----
    # Head outputs go into the (N, C) bf16 scratch slab; a single full-depth
    # o_proj matmul follows the loop.
    # TODO(synk): for very long L (>~1024) add flash-style KV tiling; the
    # (G, L, L) f32 score tensor is materialized per head here.
    for hi in range(n_head):
        q = qkv[:, hi * hd:(hi + 1) * hd].reshape(G, L, hd)
        k = qkv[:, C + hi * hd:C + (hi + 1) * hd].reshape(G, L, hd)
        v = qkv[:, 2 * C + hi * hd:2 * C + (hi + 1) * hd].reshape(G, L, hd)

        s = jnp.einsum('gqd,gkd->gqk', q, k,
                       preferred_element_type=f32)              # (G, L, L) f32
        s = s - jnp.max(s, axis=-1, keepdims=True)
        p = jnp.exp(s)
        p = p * pl.reciprocal(jnp.sum(p, axis=-1, keepdims=True), approx=True)

        y = jnp.einsum('gqk,gkd->gqd', p.astype(bf16), v,
                       preferred_element_type=f32)              # (G, L, hd)
        y_buf_ref[:, hi * hd:(hi + 1) * hd] = y.reshape(N, hd).astype(bf16)

    # Single (N, C) @ (C, C) output projection: full MXU contraction depth.
    attn_out = jnp.dot(y_buf_ref[...], w_oproj_ref[...],
                       preferred_element_type=f32)              # (N, C) f32

    # attn_dropout / resid_dropout: identity at inference.
    x = x + attn_out

    # ---- ln_2 (RMSNorm) + SwiGLU MLP ----
    h2 = x * jax.lax.rsqrt(jnp.mean(x * x, axis=-1, keepdims=True) + eps)
    h2 = (h2 * ln2_ref[...]).astype(bf16)
    a = jnp.dot(h2, w_a_ref[...], preferred_element_type=f32)       # (N, 2C)
    gate = jnp.dot(h2, w_gate_ref[...], preferred_element_type=f32)  # (N, 2C)
    act = (a * (gate * jax.nn.sigmoid(gate))).astype(bf16)           # SwiGLU
    mlp_out = jnp.dot(act, w_mproj_ref[...],
                      preferred_element_type=f32)                    # (N, C)

    o_ref[...] = (x + mlp_out).astype(o_ref.dtype)


def _tpu_budget(n_embd: int):
    """Generation-aware (vmem_limit_bytes, max_tokens_per_block)."""
    try:
        info = pltpu.get_tpu_info()
        cap = int(getattr(info, "vmem_capacity_bytes", 128 * 1024 * 1024))
    except Exception:
        cap = 128 * 1024 * 1024
    c = max(int(n_embd), 1)
    if cap >= 96 * 1024 * 1024:
        # v5e / v6e: 128 MiB physical VMEM -> large blocks amortize per-step cost.
        vmem_limit = int(cap * 0.85)
        max_tokens = max(256, min(2048, (2048 * 1024) // c))
    else:
        # v7x: 64 MiB per TensorCore -> smaller blocks, leave headroom.
        vmem_limit = int(cap * 0.80)
        max_tokens = max(128, min(1024, (512 * 1024) // c))
    return vmem_limit, max_tokens


def _pick_seqs_per_block(n_seq: int, length: int, max_tokens: int,
                         score_budget_bytes: int = 4 << 20) -> int:
    """Pick G (sequences per grid step):
      - G divides n_seq and (G*length) % 8 == 0 (or G == n_seq -> full array),
        so the (G*L, C) BlockSpec is always legal,
      - G*L fits the token budget and the per-head (G, L, L) f32 score tensor
        stays bounded,
      - prefer G leaving >= 2 grid steps so both v7x TensorCores get work."""
    legal, fitting = [], []
    for g in range(1, n_seq + 1):
        if n_seq % g:
            continue
        nt = g * length
        if (nt % 8) and g != n_seq:
            continue
        legal.append(g)
        if nt <= max(length, max_tokens) and \
           g * length * length * 4 <= max(score_budget_bytes, length * length * 4):
            fitting.append(g)
    pool = fitting if fitting else legal[:1]   # smallest legal as last resort
    multi = [g for g in pool if n_seq // g >= 2]
    return max(multi) if multi else max(pool)


@functools.partial(jax.jit, static_argnames=("n_head",))
def length_block_2d(x, params, *, n_head):
    """x: (B, L, W, C) float32 -> (B, L, W, C) float32."""
    B, L, W, C = x.shape
    ln1_w, w_attn, w_oproj, ln2_w, w_fc, w_mproj = params
    n_seq = B * W

    # Same layout change as the PyTorch module (transpose(1,2) + view), then
    # flatten to token-major (B*W*L, C) for the kernel.
    xt = jnp.transpose(x, (0, 2, 1, 3)).reshape(n_seq * L, C)

    # Weight prep (runs once under jit, outside the kernel):
    #  - fold softmax scale into the Q columns of w_attn (in f32, then cast),
    #  - split c_fc into the SwiGLU value/gate halves,
    #  - cast matmul weights to bf16; keep RMSNorm weights in f32.
    scale = 8.0 / C
    w_attn_b = jnp.concatenate(
        [w_attn[:, :C] * scale, w_attn[:, C:]], axis=1).astype(jnp.bfloat16)
    w_oproj_b = w_oproj.astype(jnp.bfloat16)
    w_a_b = w_fc[:, :2 * C].astype(jnp.bfloat16)
    w_gate_b = w_fc[:, 2 * C:].astype(jnp.bfloat16)
    w_mproj_b = w_mproj.astype(jnp.bfloat16)
    ln1 = ln1_w.astype(jnp.float32).reshape(1, C)
    ln2 = ln2_w.astype(jnp.float32).reshape(1, C)

    vmem_limit, max_tokens = _tpu_budget(C)
    G = _pick_seqs_per_block(n_seq, L, max_tokens)
    NT = G * L                                   # tokens per grid step

    kernel = functools.partial(_length_block_kernel,
                               n_head=n_head, seqs_per_block=G)

    # Grid-invariant weights: single-buffered (no 2x weight footprint in VMEM).
    def full(arr):
        nd = arr.ndim
        return pl.BlockSpec(arr.shape, lambda i, _nd=nd: (0,) * _nd,
                            pipeline_mode=pl.Buffered(1))

    out = pl.pallas_call(
        kernel,
        out_shape=jax.ShapeDtypeStruct((n_seq * L, C), x.dtype),
        grid=(n_seq // G,),
        in_specs=[
            pl.BlockSpec((NT, C), lambda i: (i, 0)),   # G*L tokens per step
            full(ln1),
            full(w_attn_b),
            full(w_oproj_b),
            full(ln2),
            full(w_a_b),
            full(w_gate_b),
            full(w_mproj_b),
        ],
        out_specs=pl.BlockSpec((NT, C), lambda i: (i, 0)),
        scratch_shapes=[pltpu.VMEM((NT, C), jnp.bfloat16)],   # per-head y slabs
        compiler_params=pltpu.CompilerParams(
            dimension_semantics=("parallel",),
            vmem_limit_bytes=vmem_limit),
    )(xt, ln1, w_attn_b, w_oproj_b, ln2, w_a_b, w_gate_b, w_mproj_b)

    # (B*W*L, C) -> (B, W, L, C) -> (B, L, W, C)
    return jnp.transpose(out.reshape(B, W, L, C), (0, 2, 1, 3))


def _reference(x, params, *, n_head):
    """Pure-JAX f32 reference mirroring the PyTorch Block forward (eval mode)."""
    ln1_w, w_attn, w_oproj, ln2_w, w_fc, w_mproj = params
    B, L, W, C = x.shape
    hd = C // n_head
    eps = 1e-5
    xt = jnp.transpose(x, (0, 2, 1, 3)).reshape(B * W, L, C)

    def rms(v, w):
        return v * jax.lax.rsqrt(jnp.mean(v * v, -1, keepdims=True) + eps) * w

    h = rms(xt, ln1_w)
    qkv = h @ w_attn
    q, k, v = jnp.split(qkv, 3, axis=-1)
    reshp = lambda t: t.reshape(B * W, L, n_head, hd).transpose(0, 2, 1, 3)
    q, k, v = reshp(q), reshp(k), reshp(v)
    s = jnp.einsum('bhqd,bhkd->bhqk', q, k) * (8.0 / C)
    p = jax.nn.softmax(s, axis=-1)
    y = jnp.einsum('bhqk,bhkd->bhqd', p, v).transpose(0, 2, 1, 3).reshape(B * W, L, C)
    xt = xt + y @ w_oproj

    h2 = rms(xt, ln2_w)
    f = h2 @ w_fc
    a, gate = jnp.split(f, 2, axis=-1)
    xt = xt + (a * (gate * jax.nn.sigmoid(gate))) @ w_mproj
    return jnp.transpose(xt.reshape(B, W, L, C), (0, 2, 1, 3))


def init_params(key, n_embd, param_std=0.02):
    """Synthetic init matching the module's parameter shapes.
    PyTorch Linear weights are (out, in); stored here pre-transposed (in, out)."""
    k1, k2, k3, k4 = jax.random.split(key, 4)
    C = n_embd
    ln1_w = jnp.ones((1, C), jnp.float32)
    ln2_w = jnp.ones((1, C), jnp.float32)
    w_attn = param_std * jax.random.normal(k1, (C, 3 * C), jnp.float32)
    w_oproj = param_std * jax.random.normal(k2, (C, C), jnp.float32)
    w_fc = param_std * jax.random.normal(k3, (C, 4 * C), jnp.float32)
    w_mproj = (param_std / np.sqrt(2)) * jax.random.normal(
        k4, (2 * C, C), jnp.float32)
    return (ln1_w, w_attn, w_oproj, ln2_w, w_fc, w_mproj)


if __name__ == "__main__":
    # Small shapes consistent with the module: (B, L, W, C), C % n_head == 0.
    B, L, W, C = 2, 16, 4, 32
    n_head = 4

    key = jax.random.PRNGKey(0)
    kx, kp = jax.random.split(key)
    x = jax.random.normal(kx, (B, L, W, C), jnp.float32)
    params = init_params(kp, C)

    # TODO(synk): dropout (p=0.05), attn_mask handling and compute_stats /
    # gradient hooks are training-time features; identity / no-ops here.

    out = jax.block_until_ready(length_block_2d(x, params, n_head=n_head))
    ref = jax.block_until_ready(_reference(x, params, n_head=n_head))

    np.testing.assert_allclose(np.asarray(out), np.asarray(ref),
                               rtol=2e-2, atol=5e-3)
    assert out.shape == (B, L, W, C)
    print("KERNEL_OK")
</pallas_src>

<mosaic_0001>
module attributes {stable_mosaic.version = 11 : i64} {
  func.func @_length_block_kernel(%arg0: i32, %arg1: memref<64x32xf32, #tpu.memory_space<vmem>>, %arg2: memref<1x32xf32, #tpu.memory_space<vmem>>, %arg3: memref<32x96xbf16, #tpu.memory_space<vmem>>, %arg4: memref<32x32xbf16, #tpu.memory_space<vmem>>, %arg5: memref<1x32xf32, #tpu.memory_space<vmem>>, %arg6: memref<32x64xbf16, #tpu.memory_space<vmem>>, %arg7: memref<32x64xbf16, #tpu.memory_space<vmem>>, %arg8: memref<64x32xbf16, #tpu.memory_space<vmem>>, %arg9: memref<64x32xf32, #tpu.memory_space<vmem>>, %arg10: memref<64x32xbf16, #tpu.memory_space<vmem>>) attributes {dimension_semantics = [#tpu.dimension_semantics<parallel>], iteration_bounds = array<i64: 2>, scalar_prefetch = 0 : i64, scratch_operands = 1 : i64, tpu.core_type = #tpu.core_type<tc>, window_params = [{transform_indices = @transform_0, window_bounds = array<i64: 64, 32>}, {pipeline_mode = #tpu.pipeline_mode<synchronous>, transform_indices = @transform_1, window_bounds = array<i64: 1, 32>}, {pipeline_mode = #tpu.pipeline_mode<synchronous>, transform_indices = @transform_2, window_bounds = array<i64: 32, 96>}, {pipeline_mode = #tpu.pipeline_mode<synchronous>, transform_indices = @transform_3, window_bounds = array<i64: 32, 32>}, {pipeline_mode = #tpu.pipeline_mode<synchronous>, transform_indices = @transform_4, window_bounds = array<i64: 1, 32>}, {pipeline_mode = #tpu.pipeline_mode<synchronous>, transform_indices = @transform_5, window_bounds = array<i64: 32, 64>}, {pipeline_mode = #tpu.pipeline_mode<synchronous>, transform_indices = @transform_6, window_bounds = array<i64: 32, 64>}, {pipeline_mode = #tpu.pipeline_mode<synchronous>, transform_indices = @transform_7, window_bounds = array<i64: 64, 32>}, {transform_indices = @transform_8, window_bounds = array<i64: 64, 32>}]} {
    %c0 = arith.constant 0 : index
    %c0_0 = arith.constant 0 : index
    %0 = vector.load %arg1[%c0, %c0_0] : memref<64x32xf32, #tpu.memory_space<vmem>>, vector<64x32xf32>
    %1 = arith.mulf %0, %0 : vector<64x32xf32>
    %cst = arith.constant dense<0.000000e+00> : vector<64xf32>
    %2 = vector.multi_reduction <add>, %1, %cst [1] : vector<64x32xf32> to vector<64xf32>
    %3 = vector.shape_cast %2 : vector<64xf32> to vector<64x1xf32>
    %cst_1 = arith.constant 3.200000e+01 : f32
    %4 = vector.broadcast %cst_1 : f32 to vector<64x1xf32>
    %5 = arith.divf %3, %4 : vector<64x1xf32>
    %cst_2 = arith.constant 9.99999974E-6 : f32
    %6 = vector.broadcast %cst_2 : f32 to vector<64x1xf32>
    %7 = arith.addf %5, %6 : vector<64x1xf32>
    %8 = math.rsqrt %7 : vector<64x1xf32>
    %9 = vector.broadcast %8 : vector<64x1xf32> to vector<64x32xf32>
    %10 = arith.mulf %0, %9 : vector<64x32xf32>
    %c0_3 = arith.constant 0 : index
    %c0_4 = arith.constant 0 : index
    %11 = vector.load %arg2[%c0_3, %c0_4] : memref<1x32xf32, #tpu.memory_space<vmem>>, vector<1x32xf32>
    %12 = vector.broadcast %11 : vector<1x32xf32> to vector<64x32xf32>
    %13 = arith.mulf %10, %12 : vector<64x32xf32>
    %14 = arith.truncf %13 : vector<64x32xf32> to vector<64x32xbf16>
    %c0_5 = arith.constant 0 : index
    %c0_6 = arith.constant 0 : index
    %15 = vector.load %arg3[%c0_5, %c0_6] : memref<32x96xbf16, #tpu.memory_space<vmem>>, vector<32x96xbf16>
    %cst_7 = arith.constant dense<0.000000e+00> : vector<64x96xf32>
    %16 = tpu.matmul %14, %15, %cst_7 {dimension_numbers = #tpu.dot_dimension_numbers<[1], [0], [0], [1], [0, 0, 1, 1], [], []>} : vector<64x32xbf16>, vector<32x96xbf16>, vector<64x96xf32> -> vector<64x96xf32>
    %17 = arith.truncf %16 : vector<64x96xf32> to vector<64x96xbf16>
    %18 = vector.extract_strided_slice %17 {offsets = [0, 0], sizes = [64, 8], strides = [1, 1]} : vector<64x96xbf16> to vector<64x8xbf16>
    %19 = vector.shape_cast %18 : vector<64x8xbf16> to vector<4x16x8xbf16>
    %20 = vector.extract_strided_slice %17 {offsets = [0, 32], sizes = [64, 8], strides = [1, 1]} : vector<64x96xbf16> to vector<64x8xbf16>
    %21 = vector.shape_cast %20 : vector<64x8xbf16> to vector<4x16x8xbf16>
    %22 = vector.extract_strided_slice %17 {offsets = [0, 64], sizes = [64, 8], strides = [1, 1]} : vector<64x96xbf16> to vector<64x8xbf16>
    %23 = vector.shape_cast %22 : vector<64x8xbf16> to vector<4x16x8xbf16>
    "tpu.trace_start"() <{level = 10 : i32, message = "gqd,gkd->gqk"}> : () -> ()
    %cst_8 = arith.constant dense<0.000000e+00> : vector<4x16x16xf32>
    %24 = tpu.matmul %19, %21, %cst_8 {dimension_numbers = #tpu.dot_dimension_numbers<[2], [2], [1], [1], [0, 0, 0, 1, 1, 1], [0], [0]>} : vector<4x16x8xbf16>, vector<4x16x8xbf16>, vector<4x16x16xf32> -> vector<4x16x16xf32>
    "tpu.trace_stop"() : () -> ()
    %cst_9 = arith.constant dense<0xFF800000> : vector<4x16xf32>
    %25 = vector.multi_reduction <maximumf>, %24, %cst_9 [2] : vector<4x16x16xf32> to vector<4x16xf32>
    %26 = vector.shape_cast %25 : vector<4x16xf32> to vector<4x16x1xf32>
    %27 = vector.broadcast %26 : vector<4x16x1xf32> to vector<4x16x16xf32>
    %28 = arith.subf %24, %27 : vector<4x16x16xf32>
    %29 = math.exp %28 : vector<4x16x16xf32>
    %cst_10 = arith.constant dense<0.000000e+00> : vector<4x16xf32>
    %30 = vector.multi_reduction <add>, %29, %cst_10 [2] : vector<4x16x16xf32> to vector<4x16xf32>
    %31 = vector.shape_cast %30 : vector<4x16xf32> to vector<4x16x1xf32>
    %32 = tpu.reciprocal %31 {approx = true} : vector<4x16x1xf32> -> vector<4x16x1xf32>
    %33 = vector.broadcast %32 : vector<4x16x1xf32> to vector<4x16x16xf32>
    %34 = arith.mulf %29, %33 : vector<4x16x16xf32>
    %35 = arith.truncf %34 : vector<4x16x16xf32> to vector<4x16x16xbf16>
    "tpu.trace_start"() <{level = 10 : i32, message = "gqk,gkd->gqd"}> : () -> ()
    %cst_11 = arith.constant dense<0.000000e+00> : vector<4x16x8xf32>
    %36 = tpu.matmul %35, %23, %cst_11 {dimension_numbers = #tpu.dot_dimension_numbers<[2], [1], [1], [2], [0, 0, 0, 1, 1, 2], [0], [0]>} : vector<4x16x16xbf16>, vector<4x16x8xbf16>, vector<4x16x8xf32> -> vector<4x16x8xf32>
    "tpu.trace_stop"() : () -> ()
    %37 = vector.shape_cast %36 : vector<4x16x8xf32> to vector<64x8xf32>
    %38 = arith.truncf %37 : vector<64x8xf32> to vector<64x8xbf16>
    %c0_12 = arith.constant 0 : index
    %c0_13 = arith.constant 0 : index
    %39 = vector.load %arg10[%c0_12, %c0_13] : memref<64x32xbf16, #tpu.memory_space<vmem>>, vector<64x8xbf16>
    tpu.vector_store %arg10[%c0_12, %c0_13], %38 {strides = array<i32>} : memref<64x32xbf16, #tpu.memory_space<vmem>>, vector<64x8xbf16>,
    %40 = vector.extract_strided_slice %17 {offsets = [0, 8], sizes = [64, 8], strides = [1, 1]} : vector<64x96xbf16> to vector<64x8xbf16>
    %41 = vector.shape_cast %40 : vector<64x8xbf16> to vector<4x16x8xbf16>
    %42 = vector.extract_strided_slice %17 {offsets = [0, 40], sizes = [64, 8], strides = [1, 1]} : vector<64x96xbf16> to vector<64x8xbf16>
    %43 = vector.shape_cast %42 : vector<64x8xbf16> to vector<4x16x8xbf16>
    %44 = vector.extract_strided_slice %17 {offsets = [0, 72], sizes = [64, 8], strides = [1, 1]} : vector<64x96xbf16> to vector<64x8xbf16>
    %45 = vector.shape_cast %44 : vector<64x8xbf16> to vector<4x16x8xbf16>
    "tpu.trace_start"() <{level = 10 : i32, message = "gqd,gkd->gqk"}> : () -> ()
    %cst_14 = arith.constant dense<0.000000e+00> : vector<4x16x16xf32>
    %46 = tpu.matmul %41, %43, %cst_14 {dimension_numbers = #tpu.dot_dimension_numbers<[2], [2], [1], [1], [0, 0, 0, 1, 1, 1], [0], [0]>} : vector<4x16x8xbf16>, vector<4x16x8xbf16>, vector<4x16x16xf32> -> vector<4x16x16xf32>
    "tpu.trace_stop"() : () -> ()
    %cst_15 = arith.constant dense<0xFF800000> : vector<4x16xf32>
    %47 = vector.multi_reduction <maximumf>, %46, %cst_15 [2] : vector<4x16x16xf32> to vector<4x16xf32>
    %48 = vector.shape_cast %47 : vector<4x16xf32> to vector<4x16x1xf32>
    %49 = vector.broadcast %48 : vector<4x16x1xf32> to vector<4x16x16xf32>
    %50 = arith.subf %46, %49 : vector<4x16x16xf32>
    %51 = math.exp %50 : vector<4x16x16xf32>
    %cst_16 = arith.constant dense<0.000000e+00> : vector<4x16xf32>
    %52 = vector.multi_reduction <add>, %51, %cst_16 [2] : vector<4x16x16xf32> to vector<4x16xf32>
    %53 = vector.shape_cast %52 : vector<4x16xf32> to vector<4x16x1xf32>
    %54 = tpu.reciprocal %53 {approx = true} : vector<4x16x1xf32> -> vector<4x16x1xf32>
    %55 = vector.broadcast %54 : vector<4x16x1xf32> to vector<4x16x16xf32>
    %56 = arith.mulf %51, %55 : vector<4x16x16xf32>
    %57 = arith.truncf %56 : vector<4x16x16xf32> to vector<4x16x16xbf16>
    "tpu.trace_start"() <{level = 10 : i32, message = "gqk,gkd->gqd"}> : () -> ()
    %cst_17 = arith.constant dense<0.000000e+00> : vector<4x16x8xf32>
    %58 = tpu.matmul %57, %45, %cst_17 {dimension_numbers = #tpu.dot_dimension_numbers<[2], [1], [1], [2], [0, 0, 0, 1, 1, 2], [0], [0]>} : vector<4x16x16xbf16>, vector<4x16x8xbf16>, vector<4x16x8xf32> -> vector<4x16x8xf32>
    "tpu.trace_stop"() : () -> ()
    %59 = vector.shape_cast %58 : vector<4x16x8xf32> to vector<64x8xf32>
    %60 = arith.truncf %59 : vector<64x8xf32> to vector<64x8xbf16>
    %c0_18 = arith.constant 0 : index
    %c8 = arith.constant 8 : index
    %61 = vector.load %arg10[%c0_18, %c8] : memref<64x32xbf16, #tpu.memory_space<vmem>>, vector<64x8xbf16>
    tpu.vector_store %arg10[%c0_18, %c8], %60 {strides = array<i32>} : memref<64x32xbf16, #tpu.memory_space<vmem>>, vector<64x8xbf16>,
    %62 = vector.extract_strided_slice %17 {offsets = [0, 16], sizes = [64, 8], strides = [1, 1]} : vector<64x96xbf16> to vector<64x8xbf16>
    %63 = vector.shape_cast %62 : vector<64x8xbf16> to vector<4x16x8xbf16>
    %64 = vector.extract_strided_slice %17 {offsets = [0, 48], sizes = [64, 8], strides = [1, 1]} : vector<64x96xbf16> to vector<64x8xbf16>
    %65 = vector.shape_cast %64 : vector<64x8xbf16> to vector<4x16x8xbf16>
    %66 = vector.extract_strided_slice %17 {offsets = [0, 80], sizes = [64, 8], strides = [1, 1]} : vector<64x96xbf16> to vector<64x8xbf16>
    %67 = vector.shape_cast %66 : vector<64x8xbf16> to vector<4x16x8xbf16>
    "tpu.trace_start"() <{level = 10 : i32, message = "gqd,gkd->gqk"}> : () -> ()
    %cst_19 = arith.constant dense<0.000000e+00> : vector<4x16x16xf32>
    %68 = tpu.matmul %63, %65, %cst_19 {dimension_numbers = #tpu.dot_dimension_numbers<[2], [2], [1], [1], [0, 0, 0, 1, 1, 1], [0], [0]>} : vector<4x16x8xbf16>, vector<4x16x8xbf16>, vector<4x16x16xf32> -> vector<4x16x16xf32>
    "tpu.trace_stop"() : () -> ()
    %cst_20 = arith.constant dense<0xFF800000> : vector<4x16xf32>
    %69 = vector.multi_reduction <maximumf>, %68, %cst_20 [2] : vector<4x16x16xf32> to vector<4x16xf32>
    %70 = vector.shape_cast %69 : vector<4x16xf32> to vector<4x16x1xf32>
    %71 = vector.broadcast %70 : vector<4x16x1xf32> to vector<4x16x16xf32>
    %72 = arith.subf %68, %71 : vector<4x16x16xf32>
    %73 = math.exp %72 : vector<4x16x16xf32>
    %cst_21 = arith.constant dense<0.000000e+00> : vector<4x16xf32>
    %74 = vector.multi_reduction <add>, %73, %cst_21 [2] : vector<4x16x16xf32> to vector<4x16xf32>
    %75 = vector.shape_cast %74 : vector<4x16xf32> to vector<4x16x1xf32>
    %76 = tpu.reciprocal %75 {approx = true} : vector<4x16x1xf32> -> vector<4x16x1xf32>
    %77 = vector.broadcast %76 : vector<4x16x1xf32> to vector<4x16x16xf32>
    %78 = arith.mulf %73, %77 : vector<4x16x16xf32>
    %79 = arith.truncf %78 : vector<4x16x16xf32> to vector<4x16x16xbf16>
    "tpu.trace_start"() <{level = 10 : i32, message = "gqk,gkd->gqd"}> : () -> ()
    %cst_22 = arith.constant dense<0.000000e+00> : vector<4x16x8xf32>
    %80 = tpu.matmul %79, %67, %cst_22 {dimension_numbers = #tpu.dot_dimension_numbers<[2], [1], [1], [2], [0, 0, 0, 1, 1, 2], [0], [0]>} : vector<4x16x16xbf16>, vector<4x16x8xbf16>, vector<4x16x8xf32> -> vector<4x16x8xf32>
    "tpu.trace_stop"() : () -> ()
    %81 = vector.shape_cast %80 : vector<4x16x8xf32> to vector<64x8xf32>
    %82 = arith.truncf %81 : vector<64x8xf32> to vector<64x8xbf16>
    %c0_23 = arith.constant 0 : index
    %c16 = arith.constant 16 : index
    %83 = vector.load %arg10[%c0_23, %c16] : memref<64x32xbf16, #tpu.memory_space<vmem>>, vector<64x8xbf16>
    tpu.vector_store %arg10[%c0_23, %c16], %82 {strides = array<i32>} : memref<64x32xbf16, #tpu.memory_space<vmem>>, vector<64x8xbf16>,
    %84 = vector.extract_strided_slice %17 {offsets = [0, 24], sizes = [64, 8], strides = [1, 1]} : vector<64x96xbf16> to vector<64x8xbf16>
    %85 = vector.shape_cast %84 : vector<64x8xbf16> to vector<4x16x8xbf16>
    %86 = vector.extract_strided_slice %17 {offsets = [0, 56], sizes = [64, 8], strides = [1, 1]} : vector<64x96xbf16> to vector<64x8xbf16>
    %87 = vector.shape_cast %86 : vector<64x8xbf16> to vector<4x16x8xbf16>
    %88 = vector.extract_strided_slice %17 {offsets = [0, 88], sizes = [64, 8], strides = [1, 1]} : vector<64x96xbf16> to vector<64x8xbf16>
    %89 = vector.shape_cast %88 : vector<64x8xbf16> to vector<4x16x8xbf16>
    "tpu.trace_start"() <{level = 10 : i32, message = "gqd,gkd->gqk"}> : () -> ()
    %cst_24 = arith.constant dense<0.000000e+00> : vector<4x16x16xf32>
    %90 = tpu.matmul %85, %87, %cst_24 {dimension_numbers = #tpu.dot_dimension_numbers<[2], [2], [1], [1], [0, 0, 0, 1, 1, 1], [0], [0]>} : vector<4x16x8xbf16>, vector<4x16x8xbf16>, vector<4x16x16xf32> -> vector<4x16x16xf32>
    "tpu.trace_stop"() : () -> ()
    %cst_25 = arith.constant dense<0xFF800000> : vector<4x16xf32>
    %91 = vector.multi_reduction <maximumf>, %90, %cst_25 [2] : vector<4x16x16xf32> to vector<4x16xf32>
    %92 = vector.shape_cast %91 : vector<4x16xf32> to vector<4x16x1xf32>
    %93 = vector.broadcast %92 : vector<4x16x1xf32> to vector<4x16x16xf32>
    %94 = arith.subf %90, %93 : vector<4x16x16xf32>
    %95 = math.exp %94 : vector<4x16x16xf32>
    %cst_26 = arith.constant dense<0.000000e+00> : vector<4x16xf32>
    %96 = vector.multi_reduction <add>, %95, %cst_26 [2] : vector<4x16x16xf32> to vector<4x16xf32>
    %97 = vector.shape_cast %96 : vector<4x16xf32> to vector<4x16x1xf32>
    %98 = tpu.reciprocal %97 {approx = true} : vector<4x16x1xf32> -> vector<4x16x1xf32>
    %99 = vector.broadcast %98 : vector<4x16x1xf32> to vector<4x16x16xf32>
    %100 = arith.mulf %95, %99 : vector<4x16x16xf32>
    %101 = arith.truncf %100 : vector<4x16x16xf32> to vector<4x16x16xbf16>
    "tpu.trace_start"() <{level = 10 : i32, message = "gqk,gkd->gqd"}> : () -> ()
    %cst_27 = arith.constant dense<0.000000e+00> : vector<4x16x8xf32>
    %102 = tpu.matmul %101, %89, %cst_27 {dimension_numbers = #tpu.dot_dimension_numbers<[2], [1], [1], [2], [0, 0, 0, 1, 1, 2], [0], [0]>} : vector<4x16x16xbf16>, vector<4x16x8xbf16>, vector<4x16x8xf32> -> vector<4x16x8xf32>
    "tpu.trace_stop"() : () -> ()
    %103 = vector.shape_cast %102 : vector<4x16x8xf32> to vector<64x8xf32>
    %104 = arith.truncf %103 : vector<64x8xf32> to vector<64x8xbf16>
    %c0_28 = arith.constant 0 : index
    %c24 = arith.constant 24 : index
    %105 = vector.load %arg10[%c0_28, %c24] : memref<64x32xbf16, #tpu.memory_space<vmem>>, vector<64x8xbf16>
    tpu.vector_store %arg10[%c0_28, %c24], %104 {strides = array<i32>} : memref<64x32xbf16, #tpu.memory_space<vmem>>, vector<64x8xbf16>,
    %c0_29 = arith.constant 0 : index
    %c0_30 = arith.constant 0 : index
    %106 = vector.load %arg10[%c0_29, %c0_30] : memref<64x32xbf16, #tpu.memory_space<vmem>>, vector<64x32xbf16>
    %c0_31 = arith.constant 0 : index
    %c0_32 = arith.constant 0 : index
    %107 = vector.load %arg4[%c0_31, %c0_32] : memref<32x32xbf16, #tpu.memory_space<vmem>>, vector<32x32xbf16>
    %cst_33 = arith.constant dense<0.000000e+00> : vector<64x32xf32>
    %108 = tpu.matmul %106, %107, %cst_33 {dimension_numbers = #tpu.dot_dimension_numbers<[1], [0], [0], [1], [0, 0, 1, 1], [], []>} : vector<64x32xbf16>, vector<32x32xbf16>, vector<64x32xf32> -> vector<64x32xf32>
    %109 = arith.addf %0, %108 : vector<64x32xf32>
    %110 = arith.mulf %109, %109 : vector<64x32xf32>
    %cst_34 = arith.constant dense<0.000000e+00> : vector<64xf32>
    %111 = vector.multi_reduction <add>, %110, %cst_34 [1] : vector<64x32xf32> to vector<64xf32>
    %112 = vector.shape_cast %111 : vector<64xf32> to vector<64x1xf32>
    %cst_35 = arith.constant 3.200000e+01 : f32
    %113 = vector.broadcast %cst_35 : f32 to vector<64x1xf32>
    %114 = arith.divf %112, %113 : vector<64x1xf32>
    %cst_36 = arith.constant 9.99999974E-6 : f32
    %115 = vector.broadcast %cst_36 : f32 to vector<64x1xf32>
    %116 = arith.addf %114, %115 : vector<64x1xf32>
    %117 = math.rsqrt %116 : vector<64x1xf32>
    %118 = vector.broadcast %117 : vector<64x1xf32> to vector<64x32xf32>
    %119 = arith.mulf %109, %118 : vector<64x32xf32>
    %c0_37 = arith.constant 0 : index
    %c0_38 = arith.constant 0 : index
    %120 = vector.load %arg5[%c0_37, %c0_38] : memref<1x32xf32, #tpu.memory_space<vmem>>, vector<1x32xf32>
    %121 = vector.broadcast %120 : vector<1x32xf32> to vector<64x32xf32>
    %122 = arith.mulf %119, %121 : vector<64x32xf32>
    %123 = arith.truncf %122 : vector<64x32xf32> to vector<64x32xbf16>
    %c0_39 = arith.constant 0 : index
    %c0_40 = arith.constant 0 : index
    %124 = vector.load %arg6[%c0_39, %c0_40] : memref<32x64xbf16, #tpu.memory_space<vmem>>, vector<32x64xbf16>
    %cst_41 = arith.constant dense<0.000000e+00> : vector<64x64xf32>
    %125 = tpu.matmul %123, %124, %cst_41 {dimension_numbers = #tpu.dot_dimension_numbers<[1], [0], [0], [1], [0, 0, 1, 1], [], []>} : vector<64x32xbf16>, vector<32x64xbf16>, vector<64x64xf32> -> vector<64x64xf32>
    %c0_42 = arith.constant 0 : index
    %c0_43 = arith.constant 0 : index
    %126 = vector.load %arg7[%c0_42, %c0_43] : memref<32x64xbf16, #tpu.memory_space<vmem>>, vector<32x64xbf16>
    %cst_44 = arith.constant dense<0.000000e+00> : vector<64x64xf32>
    %127 = tpu.matmul %123, %126, %cst_44 {dimension_numbers = #tpu.dot_dimension_numbers<[1], [0], [0], [1], [0, 0, 1, 1], [], []>} : vector<64x32xbf16>, vector<32x64xbf16>, vector<64x64xf32> -> vector<64x64xf32>
    %128 = arith.negf %127 : vector<64x64xf32>
    %129 = math.exp %128 : vector<64x64xf32>
    %cst_45 = arith.constant 1.000000e+00 : f32
    %130 = vector.broadcast %cst_45 : f32 to vector<64x64xf32>
    %131 = arith.addf %130, %129 : vector<64x64xf32>
    %132 = arith.divf %130, %131 : vector<64x64xf32>
    %133 = arith.mulf %127, %132 : vector<64x64xf32>
    %134 = arith.mulf %125, %133 : vector<64x64xf32>
    %135 = arith.truncf %134 : vector<64x64xf32> to vector<64x64xbf16>
    %c0_46 = arith.constant 0 : index
    %c0_47 = arith.constant 0 : index
    %136 = vector.load %arg8[%c0_46, %c0_47] : memref<64x32xbf16, #tpu.memory_space<vmem>>, vector<64x32xbf16>
    %cst_48 = arith.constant dense<0.000000e+00> : vector<64x32xf32>
    %137 = tpu.matmul %135, %136, %cst_48 {dimension_numbers = #tpu.dot_dimension_numbers<[1], [0], [0], [1], [0, 0, 1, 1], [], []>} : vector<64x64xbf16>, vector<64x32xbf16>, vector<64x32xf32> -> vector<64x32xf32>
    %138 = arith.addf %109, %137 : vector<64x32xf32>
    %c0_49 = arith.constant 0 : index
    %c0_50 = arith.constant 0 : index
    %139 = vector.load %arg9[%c0_49, %c0_50] : memref<64x32xf32, #tpu.memory_space<vmem>>, vector<64x32xf32>
    tpu.vector_store %arg9[%c0_49, %c0_50], %138 {strides = array<i32>} : memref<64x32xf32, #tpu.memory_space<vmem>>, vector<64x32xf32>,
    return
  }
  func.func @transform_0(%arg0: i32) -> (i32, i32) {
    %c0_i32 = arith.constant 0 : i32
    %c0_i32_0 = arith.constant 0 : i32
    return %arg0, %c0_i32 : i32, i32
  }
  func.func @transform_1(%arg0: i32) -> (i32, i32) {
    %c0_i32 = arith.constant 0 : i32
    %c0_i32_0 = arith.constant 0 : i32
    %c0_i32_1 = arith.constant 0 : i32
    return %c0_i32, %c0_i32_0 : i32, i32
  }
  func.func @transform_2(%arg0: i32) -> (i32, i32) {
    %c0_i32 = arith.constant 0 : i32
    %c0_i32_0 = arith.constant 0 : i32
    %c0_i32_1 = arith.constant 0 : i32
    return %c0_i32, %c0_i32_0 : i32, i32
  }
  func.func @transform_3(%arg0: i32) -> (i32, i32) {
    %c0_i32 = arith.constant 0 : i32
    %c0_i32_0 = arith.constant 0 : i32
    %c0_i32_1 = arith.constant 0 : i32
    return %c0_i32, %c0_i32_0 : i32, i32
  }
  func.func @transform_4(%arg0: i32) -> (i32, i32) {
    %c0_i32 = arith.constant 0 : i32
    %c0_i32_0 = arith.constant 0 : i32
    %c0_i32_1 = arith.constant 0 : i32
    return %c0_i32, %c0_i32_0 : i32, i32
  }
  func.func @transform_5(%arg0: i32) -> (i32, i32) {
    %c0_i32 = arith.constant 0 : i32
    %c0_i32_0 = arith.constant 0 : i32
    %c0_i32_1 = arith.constant 0 : i32
    return %c0_i32, %c0_i32_0 : i32, i32
  }
  func.func @transform_6(%arg0: i32) -> (i32, i32) {
    %c0_i32 = arith.constant 0 : i32
    %c0_i32_0 = arith.constant 0 : i32
    %c0_i32_1 = arith.constant 0 : i32
    return %c0_i32, %c0_i32_0 : i32, i32
  }
  func.func @transform_7(%arg0: i32) -> (i32, i32) {
    %c0_i32 = arith.constant 0 : i32
    %c0_i32_0 = arith.constant 0 : i32
    %c0_i32_1 = arith.constant 0 : i32
    return %c0_i32, %c0_i32_0 : i32, i32
  }
  func.func @transform_8(%arg0: i32) -> (i32, i32) {
    %c0_i32 = arith.constant 0 : i32
    %c0_i32_0 = arith.constant 0 : i32
    return %arg0, %c0_i32 : i32, i32
  }
}

</mosaic_0001>

<bundles_post_ra>
// kernel: length_block_2d.1
= control target key start
LH: loop header
LB: loop body
LE: loop exit
PB: predicated region body
PF: predicated region fallthrough
CT: control target
= control target key end

     0   :  { %s5497_s0 = inlined_call_operand.hbm [shape: f32[128,32], index: 0, kind: input, shape index: {}]   ;;  %s5498_s1 = inlined_call_operand.hbm [shape: f32[1,32], index: 1, kind: input, shape index: {}]   ;;  %s5499_s2 = inlined_call_operand.hbm [shape: bf16[32,96], index: 2, kind: input, shape index: {}]   ;;  %s5500_s3 = inlined_call_operand.hbm [shape: bf16[32,32], index: 3, kind: input, shape index: {}]   ;;  %s5501_s4 = inlined_call_operand.hbm [shape: f32[1,32], index: 4, kind: input, shape index: {}]   ;;  %s5502_s5 = inlined_call_operand.hbm [shape: bf16[32,64], index: 5, kind: input, shape index: {}]   ;;  %s5503_s6 = inlined_call_operand.hbm [shape: bf16[32,64], index: 6, kind: input, shape index: {}]   ;;  %s5504_s7 = inlined_call_operand.hbm [shape: bf16[64,32], index: 7, kind: input, shape index: {}]   ;;  %s5505_s8 = inlined_call_operand.hbm [shape: f32[128,32], index: 8, kind: output, shape index: {}]  }
   0x1   :  { %5509 = sst [smem:[#allocation24_spill]] %s5498_s1 }
   0x2   :  { %13 = vsyncpa [#allocation4], 0 }
   0x3   :  { %15 = vsyncpa [#allocation4 + $0x1], 0 }
   0x4   :  { %16 = vsyncpa [#allocation7], 0 }
   0x5   :  { %17 = vsyncpa [#allocation10], 0 }
   0x6   :  { %18 = vsyncpa [#allocation13], 0 }
   0x7   :  { %19 = vsyncpa [#allocation16], 0 }
   0x8   :  { %20 = vsyncpa [#allocation5], 0 }
   0x9   :  { %22 = vsyncpa [#allocation5 + $0x1], 0  ;;  %s4533_s27 = smov 0   ;;  %s4535_s28 = smov 0  }
   0xa   :  { %s4537_s29 = smov 0   ;;  %s4539_s30 = smov 0  }
   0xb LB: > { %s4458_s9 = smov [#allocation6]   ;;  %s4554_s11 = sadd.s32 4294967295, %s4456_s30   ;;  %s4456_s30 = sphi %s4539_s30, %s5534_s30   ;;  %s4452_s29 = sphi %s4537_s29, %s5533_s29   ;;  %s4448_s28 = sphi %s4535_s28, %s5532_s28   ;;  %s4444_s27 = sphi %s4533_s27, %s5531_s27  }
   0xc   : > { %s245_s10 = sshll.u32 %s4458_s9, 4  ;;  %p3343_p0 = scmp.ge.s32.totalorder %s4456_s30, 1  ;;  %s4559_s10 = int_to_ptr.vmem [resolvable:$true] %s245_s10 }
   0xd   : > { %p5506_p1 = scmp.eq.s32.totalorder %s4554_s11, 0  ;;  %p232_p2 = scmp.lt.s32.totalorder %s4456_s30, 3 }
   0xe   : > { %s4459_s13 = smov [#allocation9]   ;;  %s4460_s16 = smov [#allocation12]  }
   0xf   : > { %p4561_p3 = pnand %p3343_p0, %p232_p2  ;;  %s268_s14 = sshll.u32 %s4459_s13, 4  ;;  %s4574_s14 = int_to_ptr.vmem [resolvable:$true] %s268_s14 }
  0x10   : > { %s292_s17 = sshll.u32 %s4460_s16, 4  ;;  %s5512_s1 = sld [smem:[#allocation24_spill]]  ;;  %s4576_s17 = int_to_ptr.vmem [resolvable:$true] %s292_s17 }
  0x11   : > { %s5510_s12 = scalar_select %p4561_p3, 1, 0 }
  0x12   : > { %p3830_p5 = pneg %p4561_p3 }
  0x14   : > { %p4570_p6 = pnand %p3830_p5, %p5506_p1 }
  0x16   : > { %s4148_s20 = scalar_lea.hbm %s5512_s1, 16  ;;  %p4586_p8 = pneg %p4570_p6 }
  0x17   : > { %p4149_p7 = scmp.ne.s32.totalorder %s5512_s1, %s4148_s20  ;;  %p4155_p11 = scmp.lt.u32.totalorder %s4148_s20, %s5512_s1 }
  0x19   : > { %p4151_p9 = pnand %p4586_p8, %p4149_p7 }
  0x1b   : > { %p4152_p10 = pneg %p4151_p9 }
  0x1d   : > { %p4157_p12 = pnand %p4155_p11, %p4152_p10 }
  0x1f   : > { %4160 = shalt.err (!%p4157_p12)
}
  0x20   : > { %s4161_s26 = scalar_lea.vmem %s4559_s10, 16  ;;  %s4168_s9 = scalar_lea.vmem %s4559_s10, 32 }
  0x21   : > { %p4162_p13 = scmp.ne.s32.totalorder %s4559_s10, %s4161_s26  ;;  %p4169_p5 = scmp.lt.s32.totalorder %s4559_s10, %s4559_s10 }
  0x22   : > { %p4170_p7 = scmp.lt.s32.totalorder %s4168_s9, %s4161_s26 }
  0x23   : > { %p4164_p0 = pnand %p4162_p13, %p4586_p8 }
  0x24   : > { %p4171_p9 = por %p4170_p7, %p4169_p5 }
  0x25   : > { %p4165_p2 = pneg %p4164_p0 }
  0x27   : > { %p4172_p4 = pnand %p4171_p9, %p4165_p2 }
  0x29   : > { %4175 = shalt.err (!%p4172_p4)
}
  0x2a   : > { %3833 = dma.hbm_to_vmem [thread:$0]  (!%p4570_p6), %s5512_s1, 16, %s4559_s10, [#allocation7]  }
  0x2b   : > { %s4176_s20 = scalar_lea.hbm %s5500_s3, 256 }
  0x2c   : > { %p4177_p10 = scmp.ne.s32.totalorder %s5500_s3, %s4176_s20  ;;  %p4183_p4 = scmp.lt.u32.totalorder %s4176_s20, %s5500_s3 }
  0x2e   : > { %p4179_p11 = pnand %p4177_p10, %p4586_p8 }
  0x30   : > { %p4180_p12 = pneg %p4179_p11 }
  0x32   : > { %p4185_p13 = pnand %p4183_p4, %p4180_p12 }
  0x34   : > { %4188 = shalt.err (!%p4185_p13)
}
  0x35   : > { %s4189_s10 = scalar_lea.vmem %s4574_s14, 256  ;;  %p4197_p7 = scmp.lt.s32.totalorder %s4574_s14, %s4574_s14 }
  0x36   : > { %p4190_p0 = scmp.ne.s32.totalorder %s4574_s14, %s4189_s10  ;;  %p4198_p9 = scmp.lt.s32.totalorder %s4189_s10, %s4189_s10 }
  0x38   : > { %p4192_p2 = pnand %p4190_p0, %p4586_p8  ;;  %p4199_p10 = por %p4198_p9, %p4197_p7 }
  0x3a   : > { %p4193_p5 = pneg %p4192_p2 }
  0x3c   : > { %p4200_p11 = pnand %p4199_p10, %p4193_p5 }
  0x3e   : > { %4203 = shalt.err (!%p4200_p11)
}
  0x3f   : > { %s4461_s26 = smov 64   ;;  %s4462_s9 = smov 4  }
  0x40   : > { %3839 = dma.hbm_to_vmem [thread:$0]  (!%p4570_p6), %s5500_s3, 256, %s4574_s14, [#allocation10], %s4461_s26, %s4461_s26, %s4462_s9  }
  0x41   : > { %s4204_s20 = scalar_lea.hbm %s5502_s5, 256 }
  0x42   : > { %p4205_p12 = scmp.ne.s32.totalorder %s5502_s5, %s4204_s20  ;;  %p4211_p0 = scmp.lt.u32.totalorder %s4204_s20, %s5502_s5 }
  0x44   : > { %p4207_p4 = pnand %p4205_p12, %p4586_p8 }
  0x46   : > { %p4208_p13 = pneg %p4207_p4 }
  0x48   : > { %p4213_p2 = pnand %p4211_p0, %p4208_p13 }
  0x4a   : > { %4216 = shalt.err (!%p4213_p2)
}
  0x4b   : > { %s4217_s14 = scalar_lea.vmem %s4576_s17, 256  ;;  %p4225_p10 = scmp.lt.s32.totalorder %s4576_s17, %s4576_s17 }
  0x4c   : > { %p4218_p5 = scmp.ne.s32.totalorder %s4576_s17, %s4217_s14  ;;  %p4226_p11 = scmp.lt.s32.totalorder %s4217_s14, %s4217_s14 }
  0x4e   : > { %p4220_p7 = pnand %p4218_p5, %p4586_p8  ;;  %p4227_p12 = por %p4226_p11, %p4225_p10 }
  0x50   : > { %p4221_p9 = pneg %p4220_p7 }
  0x52   : > { %p4228_p4 = pnand %p4227_p12, %p4221_p9 }
  0x54   : > { %4231 = shalt.err (!%p4228_p4)
}
  0x55   : > { %3845 = dma.hbm_to_vmem [thread:$0]  (!%p4570_p6), %s5502_s5, 256, %s4576_s17, [#allocation13], %s4461_s26, %s4461_s26, %s4462_s9  }
  0x56   : > { %s4463_s16 = smov [#allocation8]   ;;  %s4464_s19 = smov [#allocation11]  }
  0x57   : > { %s255_s18 = sshll.u32 %s4463_s16, 4  ;;  %s282_s20 = sshll.u32 %s4464_s19, 4  ;;  %s256_s18 = int_to_ptr.vmem [resolvable:$true] %s255_s18  ;;  %s283_s20 = int_to_ptr.vmem [resolvable:$true] %s282_s20 }
  0x58   : > { %s4232_s24 = scalar_lea.hbm %s5499_s2, 256 }
  0x59   : > { %p4233_p13 = scmp.ne.s32.totalorder %s5499_s2, %s4232_s24  ;;  %p4239_p5 = scmp.lt.u32.totalorder %s4232_s24, %s5499_s2 }
  0x5b   : > { %p4235_p0 = pnand %p4233_p13, %p4586_p8 }
  0x5d   : > { %p4236_p2 = pneg %p4235_p0 }
  0x5f   : > { %p4241_p7 = pnand %p4239_p5, %p4236_p2 }
  0x61   : > { %4244 = shalt.err (!%p4241_p7)
}
  0x62   : > { %s4245_s17 = scalar_lea.vmem %s256_s18, 256  ;;  %p4253_p12 = scmp.lt.s32.totalorder %s256_s18, %s256_s18 }
  0x63   : > { %p4246_p9 = scmp.ne.s32.totalorder %s256_s18, %s4245_s17  ;;  %p4254_p4 = scmp.lt.s32.totalorder %s4245_s17, %s4245_s17 }
  0x65   : > { %p4248_p10 = pnand %p4246_p9, %p4586_p8  ;;  %p4255_p1 = por %p4254_p4, %p4253_p12 }
  0x67   : > { %p4249_p11 = pneg %p4248_p10 }
  0x69   : > { %p4256_p3 = pnand %p4255_p1, %p4249_p11 }
  0x6b   : > { %4259 = shalt.err (!%p4256_p3)
}
  0x6c   : > { %3836 = dma.hbm_to_vmem [thread:$0]  (!%p4570_p6), %s5499_s2, 256, %s256_s18, [#allocation7], %s4461_s26, %s4461_s26, %s4462_s9  }
  0x6d   : > { %s4260_s21 = scalar_lea.hbm %s5501_s4, 16 }
  0x6e   : > { %p4261_p1 = scmp.ne.s32.totalorder %s5501_s4, %s4260_s21  ;;  %p4267_p0 = scmp.lt.u32.totalorder %s4260_s21, %s5501_s4 }
  0x70   : > { %p4263_p3 = pnand %p4261_p1, %p4586_p8 }
  0x72   : > { %p4264_p13 = pneg %p4263_p3 }
  0x74   : > { %p4269_p2 = pnand %p4267_p0, %p4264_p13 }
  0x76   : > { %4272 = shalt.err (!%p4269_p2)
}
  0x77   : > { %s4273_s10 = scalar_lea.vmem %s283_s20, 16  ;;  %s4280_s18 = scalar_lea.vmem %s283_s20, 32 }
  0x78   : > { %p4274_p5 = scmp.ne.s32.totalorder %s283_s20, %s4273_s10  ;;  %p4281_p10 = scmp.lt.s32.totalorder %s283_s20, %s283_s20 }
  0x79   : > { %p4282_p11 = scmp.lt.s32.totalorder %s4280_s18, %s4273_s10 }
  0x7a   : > { %p4276_p7 = pnand %p4274_p5, %p4586_p8 }
  0x7b   : > { %p4283_p12 = por %p4282_p11, %p4281_p10 }
  0x7c   : > { %p4277_p9 = pneg %p4276_p7 }
  0x7e   : > { %p4284_p4 = pnand %p4283_p12, %p4277_p9 }
  0x80   : > { %4287 = shalt.err (!%p4284_p4)
}
  0x81   : > { %3842 = dma.hbm_to_vmem [thread:$0]  (!%p4570_p6), %s5501_s4, 16, %s283_s20, [#allocation10]  }
  0x82   : > { %s4465_s13 = smov [#allocation14]   ;;  %s4466_s19 = smov [#allocation15]  }
  0x83   : > { %s305_s16 = sshll.u32 %s4465_s13, 4  ;;  %s318_s21 = sshll.u32 %s4466_s19, 4  ;;  %s306_s16 = int_to_ptr.vmem [resolvable:$true] %s305_s16  ;;  %s319_s21 = int_to_ptr.vmem [resolvable:$true] %s318_s21 }
  0x84   : > { %s4288_s25 = scalar_lea.hbm %s5503_s6, 256 }
  0x85   : > { %p4289_p1 = scmp.ne.s32.totalorder %s5503_s6, %s4288_s25  ;;  %p4295_p0 = scmp.lt.u32.totalorder %s4288_s25, %s5503_s6 }
  0x87   : > { %p4291_p3 = pnand %p4289_p1, %p4586_p8 }
  0x89   : > { %p4292_p13 = pneg %p4291_p3 }
  0x8b   : > { %p4297_p2 = pnand %p4295_p0, %p4292_p13 }
  0x8d   : > { %4300 = shalt.err (!%p4297_p2)
}
  0x8e   : > { %s4301_s20 = scalar_lea.vmem %s306_s16, 256  ;;  %p4309_p10 = scmp.lt.s32.totalorder %s306_s16, %s306_s16 }
  0x8f   : > { %p4302_p5 = scmp.ne.s32.totalorder %s306_s16, %s4301_s20  ;;  %p4310_p11 = scmp.lt.s32.totalorder %s4301_s20, %s4301_s20 }
  0x91   : > { %p4304_p7 = pnand %p4302_p5, %p4586_p8  ;;  %p4311_p12 = por %p4310_p11, %p4309_p10 }
  0x93   : > { %p4305_p9 = pneg %p4304_p7 }
  0x95   : > { %p4312_p4 = pnand %p4311_p12, %p4305_p9 }
  0x97   : > { %4315 = shalt.err (!%p4312_p4)
}
  0x98   : > { %3848 = dma.hbm_to_vmem [thread:$0]  (!%p4570_p6), %s5503_s6, 256, %s306_s16, [#allocation13], %s4461_s26, %s4461_s26, %s4462_s9  }
  0x99   : > { %s4316_s24 = scalar_lea.hbm %s5504_s7, 512 }
  0x9a   : > { %p4317_p1 = scmp.ne.s32.totalorder %s5504_s7, %s4316_s24  ;;  %p4323_p0 = scmp.lt.u32.totalorder %s4316_s24, %s5504_s7 }
  0x9c   : > { %p4319_p3 = pnand %p4317_p1, %p4586_p8 }
  0x9e   : > { %p4320_p13 = pneg %p4319_p3 }
  0xa0   : > { %p4325_p2 = pnand %p4323_p0, %p4320_p13 }
  0xa2   : > { %4328 = shalt.err (!%p4325_p2)
}
  0xa3   : > { %s4329_s17 = scalar_lea.vmem %s319_s21, 512  ;;  %p4337_p10 = scmp.lt.s32.totalorder %s319_s21, %s319_s21 }
  0xa4   : > { %p4330_p5 = scmp.ne.s32.totalorder %s319_s21, %s4329_s17  ;;  %p4338_p11 = scmp.lt.s32.totalorder %s4329_s17, %s4329_s17 }
  0xa6   : > { %p4332_p7 = pnand %p4330_p5, %p4586_p8  ;;  %p4339_p12 = por %p4338_p11, %p4337_p10 }
  0xa8   : > { %p4333_p9 = pneg %p4332_p7 }
  0xaa   : > { %p4340_p4 = pnand %p4339_p12, %p4333_p9 }
  0xac   : > { %4343 = shalt.err (!%p4340_p4)
}
  0xad   : > { %3851 = dma.hbm_to_vmem [thread:$0]  (!%p4570_p6), %s5504_s7, 512, %s319_s21, [#allocation16], %s4461_s26, %s4461_s26, %s4462_s9  }
  0xae   : > { %s3342_s15 = sadd.s32 4294967294, %s4456_s30   ;;  %s4743_s23 = sadd.s32 1, %s4456_s30  }
  0xaf   : > { %s35_s1 = sadd.s32 1, %s4452_s29  ;;  %s32_s13 = ssub.s32 %s4456_s30, %s4743_s23 }
  0xb0   : > { %p42_p8 = scmp.ne.s32.totalorder %s4452_s29, %s4448_s28  ;;  %p33_p1 = scmp.eq.s32.totalorder %s32_s13, 0 }
  0xb1   : > { %p43_p3 = scmp.eq.s32.totalorder %s4456_s30, 0  ;;  %p48_p13 = scmp.ne.s32.totalorder %s4448_s28, %s4444_s27 }
  0xb2   : > { %p219_p0 = scmp.eq.s32.totalorder %s4554_s11, 1  ;;  %p5514_p5 = scmp.eq.s32.totalorder %s4554_s11, 0 }
  0xb3   : > { %s4755_s19 = scalar_select %p33_p1, %s4452_s29, %s35_s1  }
  0xb4   : > { %p44_p2 = por %p43_p3, %p42_p8  ;;  %p4759_p7 = por %p5514_p5, %p48_p13 }
  0xb5   : > { %p4763_p6 = por %p219_p0, %p42_p8  ;;  %p225_p9 = scmp.eq.s32.totalorder %s3342_s15, 1 }
  0xb6   : > { %p3867_p10 = scmp.lt.s32.totalorder %s4456_s30, 2  ;;  %s332_s9 = sand.u32 1, %s4452_s29  }
  0xb7   : > { %s5516_s26 = scalar_select %p4763_p6, 1, 0 }
  0xb8   : > { %p4769_p11 = por %p225_p9, %p48_p13  ;;  %s3352_s24 = sshll.u32 %s332_s9, 6 }
  0xb9   : > { %s3444_s25 = sshll.u32 %s4456_s30, 10  ;;  %s336_s17 = scalar_lea.vmem [#allocation3], %s3352_s24 }
  0xba   : > { %s5517_s21 = scalar_select %p4769_p11, 1, 0 }
  0xbb   : > { %s4777_s18 = scalar_lea.hbm %s5497_s0, %s3444_s25  ;;  %s343_s16 = sshll.u32 %s336_s17, 4  ;;  %s4783_s16 = int_to_ptr.vmem [resolvable:$true] %s343_s16 }
  0xbc   : > { %p4779_p12 = pnand %p3867_p10, %p44_p2  ;;  %s4785_s15 = scalar_lea.sflag [#allocation4], %s332_s9 }
  0xbd   : > { %s4344_s1 = scalar_lea.hbm %s4777_s18, 1024  ;;  %s4349_s25 = scalar_lea.hbm %s5497_s0, 2048 }
  0xbe   : > { %p4345_p4 = scmp.ne.s32.totalorder %s4777_s18, %s4344_s1  ;;  %p4346_p8 = pneg %p4779_p12 }
  0xbf   : > { %p4350_p13 = scmp.lt.u32.totalorder %s4777_s18, %s5497_s0  ;;  %p4351_p0 = scmp.lt.u32.totalorder %s4349_s25, %s4344_s1 }
  0xc0   : > { %p4347_p1 = pnand %p4346_p8, %p4345_p4  ;;  %p4353_p5 = scmp.lt.u32.totalorder %s4344_s1, %s4777_s18 }
  0xc1   : > { %p4352_p2 = por %p4351_p0, %p4350_p13 }
  0xc2   : > { %p4348_p3 = pneg %p4347_p1 }
  0xc3   : > { %p4354_p9 = por %p4353_p5, %p4352_p2 }
  0xc5   : > { %p4355_p10 = pnand %p4354_p9, %p4348_p3 }
  0xc7   : > { %4358 = shalt.err (!%p4355_p10)
}
  0xc8   : > { %s4359_s9 = scalar_lea.vmem %s4783_s16, 1024  ;;  %s4467_s17 = smov [#allocation3]  }
  0xc9   : > { %p4360_p4 = scmp.ne.s32.totalorder %s4783_s16, %s4359_s9  ;;  %s4364_s13 = sshll.u32 %s4467_s17, 4  ;;  %s4365_s13 = int_to_ptr.vmem [resolvable:$false] %s4364_s13 }
  0xca   : > { %s4366_s24 = scalar_lea.vmem %s4365_s13, 2048  ;;  %p4367_p6 = scmp.lt.s32.totalorder %s4783_s16, %s4365_s13 }
  0xcb   : > { %p4362_p1 = pnand %p4360_p4, %p4346_p8  ;;  %p4368_p13 = scmp.lt.s32.totalorder %s4366_s24, %s4359_s9 }
  0xcd   : > { %p4363_p11 = pneg %p4362_p1  ;;  %p4369_p0 = por %p4368_p13, %p4367_p6 }
  0xcf   : > { %p4370_p2 = pnand %p4369_p0, %p4363_p11 }
  0xd1   : > { %4373 = shalt.err (!%p4370_p2)
}
  0xd2   : > { %s4468_s1 = smov 128   ;;  %s4469_s25 = smov 8  }
  0xd3   : > { %3855 = dma.hbm_to_vmem [thread:$0]  (!%p4779_p12), %s4777_s18, 1024, %s4783_s16, %s4785_s15, %s4468_s1, %s4468_s1, %s4469_s25  }
  0xd4   : > { %p5519_p8 = scmp.ne.s32.totalorder %s5510_s12, 0 }
  0xd5   : > { %s4816_s14 = sand.u32 (!%p5519_p8), 1, %s4448_s28  }
  0xd6   : > { %355 = sbr.rel (%p5519_p8) target bundleno = 4346 (0x10fa), region = 52  ;;  %s3356_s10 = sshll.u32 (!%p5519_p8), %s4816_s14, 6 }
  0xd7   : > { %s358_s9 = scalar_lea.sflag (!%p5519_p8), [#allocation4], %s4816_s14  ;;  %s4822_s17 = scalar_lea.vmem (!%p5519_p8), [#allocation3], %s3356_s10 }
  0xdd   : > { %4419 = dma.done.wait (%p4759_p7), %s358_s9, 1024  }
  0xde   : > { %4421 = vsyncadd (%p4759_p7), %s358_s9, 4294966272  ;;  %p5520_p6 = scmp.eq.s32.totalorder %s4554_s11, 0 }
  0xe0   : > { %4423 = dma.done.wait (%p5520_p6), [#allocation7], 272   ;;  %p5521_p11 = pmov %p5520_p6 }
  0xe1   : > { %p5522_p12 = pmov %p5520_p6 }
  0xe2   : > { %4425 = vsyncadd (%p5521_p11), [#allocation7], 4294967024 }
  0xe3   : > { %4427 = dma.done.wait (%p5522_p12), [#allocation10], 272   ;;  %p5523_p3 = pmov %p5520_p6 }
  0xe5   : > { %4429 = vsyncadd (%p5523_p3), [#allocation10], 4294967024  ;;  %p5524_p5 = pmov %p5523_p3 }
  0xe6   : > { %p5525_p9 = pmov %p5523_p3 }
  0xe7   : > { %4431 = dma.done.wait (%p5524_p5), [#allocation13], 512  }
  0xe8   : > { %4433 = vsyncadd (%p5525_p9), [#allocation13], 4294966784  ;;  %p5526_p7 = pmov %p5523_p3 }
  0xe9   : > { %p5527_p10 = pmov %p5523_p3 }
  0xea   : > { %4435 = dma.done.wait (%p5526_p7), [#allocation16], 512  }
  0xeb   : > { %4437 = vsyncadd (%p5527_p10), [#allocation16], 4294966784  ;;  %v4845_v0 = vld [vmem:[%s4822_s17 + $0x10] sm:$0xff]  ;;  %vm441_vm0 = vcmask 261120   ;;  %v4848_v1 = vld [vmem:[%s4822_s17] sm:$0xff]  ;;  %vm4471_vm1 = vmmov 0  }
  0xec   : > { %v4851_v2 = vld [vmem:[%s4822_s17 + $0x18] sm:$0xff]  ;;  %v435_v3 = vmul.f32 %v4845_v0, %v4845_v0  ;;  %v433_v4 = vmul.f32 %v4848_v1, %v4848_v1  ;;  %v4860_v6 = vld [vmem:[%s4822_s17 + $0x8] sm:$0xff]  ;;  %v4866_v8 = vld [vmem:[%s4822_s17 + $0x20] sm:$0xff]  ;;  %s4472_s12 = smov 96   ;;  %vm618_vm2 = vcmask 64512   ;;  %vm816_vm3 = vcmask 130048  }
  0xed   : > { %v436_v5 = vmul.f32 %v4851_v2, %v4851_v2  ;;  %v4863_v7 = vld [vmem:[%s4822_s17 + $0x28] sm:$0xff]  ;;  %v434_v9 = vmul.f32 %v4860_v6, %v4860_v6  ;;  %v437_v11 = vmul.f32 %v4866_v8, %v4866_v8  ;;  %v4877_v14 = vld [vmem:[%s4822_s17 + $0x38] sm:$0xff]  ;;  %v4880_v15 = vld [vmem:[%s4822_s17 + $0x30] sm:$0xff]  ;;  %s4473_s22 = smov 64   ;;  %s4474_s18 = smov 88   ;;  %vm1609_vm4 = vcmask 130112  }
  0xee   : > { %v438_v10 = vmul.f32 %v4863_v7, %v4863_v7  ;;  %v448_v12 = vsel %vm441_vm0, %v435_v3, 0.0  ;;  %v442_v13 = vsel %vm441_vm0, %v433_v4, 0.0  ;;  %v440_v20 = vmul.f32 %v4877_v14, %v4877_v14  ;;  %v3936_v24 = vld [vmem:[#allocation8] sm:$0xff]   ;;  %v3937_v25 = vld [vmem:[#allocation8 + $0x8] sm:$0xff]   ;;  %v3365_v55 = vld [vmem:[#allocation6] ss:$0 sm:$0xff] }
  0xef   : > { %449 = vadd.xlane.f32.xlu1 %v448_v12  ;;  %443 = vadd.xlane.f32.xlu0 %v442_v13  ;;  %v451_v16 = vsel %vm441_vm0, %v436_v5, 0.0  ;;  %v445_v17 = vsel %vm441_vm0, %v434_v9, 0.0  ;;  %v454_v19 = vsel %vm441_vm0, %v437_v11, 0.0  ;;  %v439_v21 = vmul.f32 %v4880_v15, %v4880_v15  ;;  %s4475_s16 = smov 120   ;;  %s4476_s20 = smov 56  }
  0xf0   : > { %v457_v18 = vsel %vm441_vm0, %v438_v10, 0.0  ;;  %v463_v22 = vsel %vm441_vm0, %v440_v20, 0.0  ;;  %3542 = vmatprep.subr.bf16.mxu0 %v3936_v24  ;;  %s4477_s15 = smov 80   ;;  %s4478_s13 = smov 112   ;;  %vm2118_vm5 = vcmask 195712   ;;  %vm2627_vm6 = vcmask 261312  }
  0xf1   : > { %v460_v23 = vsel %vm441_vm0, %v439_v21, 0.0  ;;  %3543 = vmatpush3.bf16.msra.mxu0 %v3936_v24  ;;  %s4479_s24 = smov 48   ;;  %s4480_s1 = smov 72   ;;  %vm3094_vm7 = vcmask 523264  }
  0xf2   : > { %3544 = vmatprep.subr.bf16.mxu0 %v3937_v25  ;;  %s4481_s25 = smov 104   ;;  %s4482_s9 = smov 40  }
  0xf3   : > { %452 = vadd.xlane.f32.xlu1 %v451_v16  ;;  %446 = vadd.xlane.f32.xlu0 %v445_v17  ;;  %p5528_p1 = scmp.ne.s32.totalorder %s5516_s26, 0 }
  0xf5   : > { %3545 = vmatpush3.bf16.msra.mxu0 %v3937_v25 }
  0xf7   : > { %458 = vadd.xlane.f32.xlu1 %v457_v18  ;;  %455 = vadd.xlane.f32.xlu0 %v454_v19 }
  0xfb   : > { %464 = vadd.xlane.f32.xlu1 %v463_v22  ;;  %461 = vadd.xlane.f32.xlu0 %v460_v23 }
 0x17c   : > { %v450_v26 = vpop.xlane.xlu1 %449  ;;  %v444_v27 = vpop.xlane.xlu0 %443 }
 0x17d   : > { %v469_v28 = vmul.f32 0.03125, %v450_v26  ;;  %v467_v29 = vmul.f32 0.03125, %v444_v27 }
 0x17f   : > { %v477_v30 = vadd.f32 1e-05, %v469_v28  ;;  %v475_v31 = vadd.f32 1e-05, %v467_v29 }
 0x180   : > { %v453_v32 = vpop.xlane.xlu1 %452  ;;  %v447_v33 = vpop.xlane.xlu0 %446 }
 0x181   : > { %3948 = vrsqrt.f32 %v477_v30  ;;  %v470_v34 = vmul.f32 0.03125, %v453_v32  ;;  %v468_v35 = vmul.f32 0.03125, %v447_v33 }
 0x182   : > { %3950 = vrsqrt.f32 %v475_v31 }
 0x183   : > { %v478_v36 = vadd.f32 1e-05, %v470_v34  ;;  %v476_v37 = vadd.f32 1e-05, %v468_v35 }
 0x184   : > { %v459_v38 = vpop.xlane.xlu1 %458  ;;  %v456_v39 = vpop.xlane.xlu0 %455 }
 0x185   : > { %3952 = vrsqrt.f32 %v478_v36  ;;  %v472_v40 = vmul.f32 0.03125, %v459_v38  ;;  %v471_v41 = vmul.f32 0.03125, %v456_v39 }
 0x186   : > { %3954 = vrsqrt.f32 %v476_v37 }
 0x187   : > { %v480_v42 = vadd.f32 1e-05, %v472_v40  ;;  %v479_v43 = vadd.f32 1e-05, %v471_v41 }
 0x188   : > { %v465_v44 = vpop.xlane.xlu1 %464  ;;  %v462_v45 = vpop.xlane.xlu0 %461 }
 0x189   : > { %3956 = vrsqrt.f32 %v480_v42  ;;  %v474_v46 = vmul.f32 0.03125, %v465_v44  ;;  %v473_v47 = vmul.f32 0.03125, %v462_v45 }
 0x18a   : > { %3958 = vrsqrt.f32 %v479_v43 }
 0x18b   : > { %v3949_v48 = vpop.eup %3948  ;;  %v482_v49 = vadd.f32 1e-05, %v474_v46  ;;  %v481_v50 = vadd.f32 1e-05, %v473_v47 }
 0x18c   : > { %v3951_v51 = vpop.eup %3950  ;;  %v493_v52 = vmul.f32 %v3949_v48, %v4845_v0 }
 0x18d   : > { %3960 = vrsqrt.f32 %v482_v49  ;;  %v491_v54 = vmul.f32 %v3951_v51, %v4848_v1 }
 0x18e   : > { %3962 = vrsqrt.f32 %v481_v50  ;;  %v508_v59 = vmul.f32 %v3365_v55, %v493_v52 }
 0x18f   : > { %v3953_v53 = vpop.eup %3952  ;;  %v506_v62 = vmul.f32 %v3365_v55, %v491_v54 }
 0x190   : > { %v3955_v56 = vpop.eup %3954  ;;  %v494_v57 = vmul.f32 %v3953_v53, %v4851_v2 }
 0x191   : > { %v492_v58 = vmul.f32 %v3955_v56, %v4860_v6 }
 0x192   : > { %v509_v60 = vmul.f32 %v3365_v55, %v494_v57 }
 0x193   : > { %v3957_v61 = vpop.eup %3956  ;;  %v507_v63 = vmul.f32 %v3365_v55, %v492_v58 }
 0x194   : > { %v3959_v3 = vpop.eup %3958  ;;  %v515_v4 = vpack.c.bf16 %v509_v60, %v508_v59  ;;  %v496_v5 = vmul.f32 %v3957_v61, %v4863_v7 }
 0x195   : > { %v514_v9 = vpack.c.bf16 %v507_v63, %v506_v62  ;;  %v495_v0 = vmul.f32 %v3959_v3, %v4866_v8  ;;  %v4470_v8 = vmov 0.0  }
 0x196   : > { %v511_v10 = vmul.f32 %v3365_v55, %v496_v5  ;;  %3554 = vmatprep.subr.bf16.mxu1 %v4470_v8  ;;  %3566 = vmatprep.subr.bf16.mxu0 %v4470_v8 }
 0x197   : > { %v3961_v1 = vpop.eup %3960  ;;  %3546 = vmatprep.mubr.msk.bf16.mxu0 %vm441_vm0, %v514_v9  ;;  %v510_v11 = vmul.f32 %v3365_v55, %v495_v0  ;;  %3556 = vmatprep.mubr.msk.bf16.mxu1 %vm4471_vm1, %v4470_v8 }
 0x198   : > { %v3963_v2 = vpop.eup %3962  ;;  %3547 = vmatmul.mubr.msk.bf16.vlgmr.msra.gmra.mrb[0].mxu0 %vm441_vm0, %v515_v4  ;;  %v498_v6 = vmul.f32 %v3961_v1, %v4877_v14 }
 0x199   : > { %v516_v12 = vpack.c.bf16 %v511_v10, %v510_v11  ;;  %v497_v13 = vmul.f32 %v3963_v2, %v4880_v15 }
 0x19a   : > { %v513_v16 = vmul.f32 %v3365_v55, %v498_v6 }
 0x19b   : > { %3550 = vmatprep.mubr.msk.bf16.mxu0 %vm441_vm0, %v516_v12  ;;  %v512_v7 = vmul.f32 %v3365_v55, %v497_v13 }
 0x19d   : > { %v517_v17 = vpack.c.bf16 %v513_v16, %v512_v7 }
 0x1a0   : > { %3551 = vmatmul.mubr.msk.bf16.gmra.mrb[4].mxu0 %vm441_vm0, %v517_v17 }
 0x1a1   : > { %3568 = vmatprep.mubr.msk.bf16.mxu0 %vm4471_vm1, %v4470_v8 }
 0x26b   : > { %v3548_v14 = vpop.f32.mrb[0].mxu0 }
 0x26c   : > { %v580_v15 = vpop.f32.mrb[1].mxu0 }
 0x26d   : > { %v3549_v18 = vpop.f32.mrb[2].mxu0 }
 0x26e   : > { %v4910_v19 = vpack.c.bf16 %v3549_v18, %v3548_v14  ;;  %v583_v20 = vpop.f32.mrb[3].mxu0 }
 0x26f   : > { %v4912_v21 = vpack.c.bf16 %v583_v20, %v580_v15 }
 0x270   : > { %667 = vrot.lane.b32.xlu1 %v4910_v19, %s4472_s12 }
 0x271   : > { %616 = vrot.lane.b32.xlu0 %v4912_v21, %s4472_s12 }
 0x273   : > { %v3552_v22 = vpop.f32.mrb[4].mxu0 }
 0x274   : > { %v596_v23 = vpop.f32.mrb[5].mxu0 }
 0x275   : > { %v3553_v24 = vpop.f32.mrb[6].mxu0 }
 0x276   : > { %v4916_v25 = vpack.c.bf16 %v3553_v24, %v3552_v22  ;;  %v599_v26 = vpop.f32.mrb[7].mxu0 }
 0x277   : > { %v4918_v27 = vpack.c.bf16 %v599_v26, %v596_v23 }
 0x279   : > { %717 = vrot.lane.b32.xlu1 %v4918_v27, %s4472_s12 }
 0x27d   : > { %767 = vrot.lane.b32.xlu1 %v4916_v25, %s4472_s12  ;;  %s4483_s12 = smov 8  }
 0x2e2   : > { %v668_v30 = vpop.permute.xlu1 %667 }
 0x2e3   : > { %v617_v28 = vpop.permute.xlu0 %616  ;;  %v673_v32 = vsel %vm618_vm2, %v668_v30, 0 }
 0x2e4   : > { %v623_v29 = vsel %vm618_vm2, %v617_v28, 0 }
 0x2e5   : > { %3555 = vmatpush3.bf16.xpose.msra.mxu1 %v623_v29 }
 0x2e6   : > { %3560 = vmatprep.subr.bf16.mxu1 %v4470_v8 }
 0x2eb   : > { %v718_v31 = vpop.permute.xlu1 %717 }
 0x2ec   : > { %v723_v33 = vsel %vm618_vm2, %v718_v31, 0  ;;  %3557 = vmatmul.mubr.msk.bf16.vlgmr.msra.gmra.mrb[0].mxu1 %vm618_vm2, %v4912_v21 }
 0x2ed   : > { %3561 = vmatpush3.bf16.xpose.msra.mxu1 %v673_v32  ;;  %3567 = vmatpush3.bf16.xpose.msra.mxu0 %v723_v33 }
 0x2ee   : > { %3562 = vmatprep.mubr.msk.bf16.mxu1 %vm4471_vm1, %v4470_v8  ;;  %3572 = vmatprep.subr.bf16.mxu1 %v4470_v8 }
 0x2ef   : > { %3578 = vmatprep.subr.bf16.mxu0 %v4470_v8  ;;  %v768_v34 = vpop.permute.xlu1 %767 }
 0x2f0   : > { %v773_v35 = vsel %vm618_vm2, %v768_v34, 0 }
 0x2f4   : > { %3563 = vmatmul.mubr.msk.bf16.vlgmr.msra.gmra.mrb[4].mxu1 %vm618_vm2, %v4910_v19  ;;  %3569 = vmatmul.mubr.msk.bf16.vlgmr.msra.gmra.mrb[8].mxu0 %vm618_vm2, %v4918_v27 }
 0x2f5   : > { %3573 = vmatpush3.bf16.xpose.msra.mxu1 %v773_v35  ;;  %3574 = vmatprep.mubr.msk.bf16.mxu1 %vm4471_vm1, %v4470_v8 }
 0x2f6   : > { %3584 = vmatprep.subr.bf16.mxu1 %v4470_v8  ;;  %3580 = vmatprep.mubr.msk.bf16.mxu0 %vm4471_vm1, %v4470_v8 }
 0x2fc   : > { %3575 = vmatmul.mubr.msk.bf16.vlgmr.msra.gmra.mrb[8].mxu1 %vm618_vm2, %v4916_v25 }
 0x2fd   : > { %3586 = vmatprep.mubr.msk.bf16.mxu1 %vm4471_vm1, %v4470_v8 }
 0x3bf   : > { %v659_v36 = vpop.f32.mrb[0].mxu1 }
 0x3c0   : > { %v3558_v37 = vpop.f32.mrb[1].mxu1  ;;  %v817_v38 = vsel %vm816_vm3, %v659_v36, -inf }
 0x3c1   : > { %818 = vmax.xlane.f32.xlu0 %v817_v38  ;;  %v662_v39 = vpop.f32.mrb[2].mxu1 }
 0x3c2   : > { %v3559_v40 = vpop.f32.mrb[3].mxu1  ;;  %v820_v41 = vsel %vm816_vm3, %v662_v39, -inf }
 0x3c3   : > { %821 = vmax.xlane.f32.xlu1 %v820_v41 }
 0x3c7   : > { %v709_v42 = vpop.f32.mrb[4].mxu1  ;;  %v759_v43 = vpop.f32.mrb[8].mxu0 }
 0x3c8   : > { %v3564_v44 = vpop.f32.mrb[5].mxu1  ;;  %v3570_v45 = vpop.f32.mrb[9].mxu0  ;;  %v823_v46 = vsel %vm816_vm3, %v709_v42, -inf  ;;  %v829_v55 = vsel %vm816_vm3, %v759_v43, -inf }
 0x3c9   : > { %v762_v47 = vpop.f32.mrb[10].mxu0  ;;  %824 = vmax.xlane.f32.xlu0 %v823_v46  ;;  %v712_v48 = vpop.f32.mrb[6].mxu1 }
 0x3ca   : > { %v3565_v49 = vpop.f32.mrb[7].mxu1  ;;  %v3571_v50 = vpop.f32.mrb[11].mxu0  ;;  %v832_v51 = vsel %vm816_vm3, %v762_v47, -inf  ;;  %v826_v52 = vsel %vm816_vm3, %v712_v48, -inf }
 0x3cb   : > { %833 = vmax.xlane.f32.xlu1 %v832_v51 }
 0x3cd   : > { %827 = vmax.xlane.f32.xlu0 %v826_v52 }
 0x3cf   : > { %v809_v53 = vpop.f32.mrb[8].mxu1 }
 0x3d0   : > { %v3576_v54 = vpop.f32.mrb[9].mxu1  ;;  %v835_v58 = vsel %vm816_vm3, %v809_v53, -inf }
 0x3d1   : > { %830 = vmax.xlane.f32.xlu0 %v829_v55  ;;  %v4952_v56 = vpop.f32.mrb[10].mxu1 }
 0x3d2   : > { %v3577_v57 = vpop.f32.mrb[11].mxu1  ;;  %v838_v59 = vsel %vm816_vm3, %v4952_v56, -inf }
 0x3d5   : > { %836 = vmax.xlane.f32.xlu0 %v835_v58 }
 0x3dc   : > { %956 = vrot.lane.b32.xlu1 %v4910_v19, %s4473_s22 }
 0x3e0   : > { %1003 = vrot.lane.b32.xlu1 %v4918_v27, %s4473_s22 }
 0x3eb   : > { %909 = vrot.lane.b32.xlu0 %v4912_v21, %s4473_s22 }
 0x404   : > { %839 = vmax.xlane.f32.xlu1 %v838_v59 }
 0x415   : > { %1050 = vrot.lane.b32.xlu1 %v4916_v25, %s4473_s22  ;;  %s4484_s22 = smov 16  }
 0x44e   : > { %v819_v60 = vpop.xlane.xlu0 %818 }
 0x44f   : > { %v841_v61 = vsub.f32 %v659_v36, %v819_v60 }
 0x450   : > { %v822_v62 = vpop.xlane.xlu1 %821 }
 0x451   : > { %v849_v63 = vmul.f32 1.442695, %v841_v61  ;;  %v842_v3 = vsub.f32 %v662_v39, %v822_v62 }
 0x453   : > { %3964 = vpow2.f32 %v849_v63  ;;  %v851_v4 = vmul.f32 1.442695, %v842_v3 }
 0x455   : > { %3966 = vpow2.f32 %v851_v4 }
 0x456   : > { %v825_v5 = vpop.xlane.xlu0 %824 }
 0x457   : > { %v843_v9 = vsub.f32 %v709_v42, %v825_v5 }
 0x458   : > { %v834_v0 = vpop.xlane.xlu1 %833 }
 0x459   : > { %v853_v10 = vmul.f32 1.442695, %v843_v9  ;;  %v846_v1 = vsub.f32 %v762_v47, %v834_v0 }
 0x45a   : > { %v828_v11 = vpop.xlane.xlu0 %827 }
 0x45b   : > { %3968 = vpow2.f32 %v853_v10  ;;  %v844_v2 = vsub.f32 %v712_v48, %v828_v11  ;;  %v859_v13 = vmul.f32 1.442695, %v846_v1 }
 0x45c   : > { %v957_v6 = vpop.permute.xlu1 %956 }
 0x45d   : > { %v4961_v12 = vpop.eup %3964  ;;  %v855_v16 = vmul.f32 1.442695, %v844_v2  ;;  %3585 = vmatpush3.bf16.msra.mxu1 %v957_v6 }
 0x45e   : > { %v831_v7 = vpop.xlane.xlu0 %830  ;;  %v865_v17 = vsel %vm816_vm3, %v4961_v12, 0.0  ;;  %3596 = vmatprep.subr.bf16.mxu1 %v4470_v8 }
 0x45f   : > { %v3967_v14 = vpop.eup %3966  ;;  %3970 = vpow2.f32 %v855_v16  ;;  %v845_v15 = vsub.f32 %v759_v43, %v831_v7  ;;  %866 = vadd.xlane.f32.xlu0 %v865_v17 }
 0x460   : > { %v868_v18 = vsel %vm816_vm3, %v3967_v14, 0.0  ;;  %3972 = vpow2.f32 %v859_v13  ;;  %v1004_v38 = vpop.permute.xlu1 %1003 }
 0x461   : > { %v857_v20 = vmul.f32 1.442695, %v845_v15  ;;  %869 = vadd.xlane.f32.xlu1 %v868_v18 }
 0x462   : > { %v837_v22 = vpop.xlane.xlu0 %836 }
 0x463   : > { %3974 = vpow2.f32 %v857_v20  ;;  %v847_v23 = vsub.f32 %v809_v53, %v837_v22 }
 0x465   : > { %v3969_v24 = vpop.eup %3968  ;;  %v861_v26 = vmul.f32 1.442695, %v847_v23 }
 0x466   : > { %v910_v28 = vpop.permute.xlu0 %909  ;;  %v871_v29 = vsel %vm816_vm3, %v3969_v24, 0.0 }
 0x467   : > { %3976 = vpow2.f32 %v861_v26  ;;  %872 = vadd.xlane.f32.xlu0 %v871_v29  ;;  %3579 = vmatpush3.bf16.msra.mxu0 %v910_v28 }
 0x468   : > { %3590 = vmatprep.subr.bf16.mxu0 %v4470_v8 }
 0x469   : > { %v3971_v30 = vpop.eup %3970 }
 0x46a   : > { %v874_v31 = vsel %vm816_vm3, %v3971_v30, 0.0  ;;  %v3973_v32 = vpop.eup %3972 }
 0x46b   : > { %875 = vadd.xlane.f32.xlu1 %v874_v31  ;;  %v880_v35 = vsel %vm816_vm3, %v3973_v32, 0.0 }
 0x46d   : > { %v3975_v33 = vpop.eup %3974 }
 0x46e   : > { %v877_v34 = vsel %vm816_vm3, %v3975_v33, 0.0 }
 0x46f   : > { %878 = vadd.xlane.f32.xlu0 %v877_v34  ;;  %881 = vadd.xlane.f32.xlu1 %v880_v35 }
 0x471   : > { %v4972_v36 = vpop.eup %3976 }
 0x472   : > { %v883_v37 = vsel %vm816_vm3, %v4972_v36, 0.0 }
 0x473   : > { %884 = vadd.xlane.f32.xlu0 %v883_v37 }
 0x480   : > { %1158 = vrot.lane.b32.xlu1 %v4910_v19, %s4474_s18 }
 0x489   : > { %1107 = vrot.lane.b32.xlu0 %v4912_v21, %s4474_s18 }
 0x48d   : > { %1105 = vrot.lane.b32.xlu0 %v4912_v21, %s4475_s16 }
 0x491   : > { %1156 = vrot.lane.b32.xlu0 %v4910_v19, %s4475_s16  ;;  %v840_v39 = vpop.xlane.xlu1 %839 }
 0x492   : > { %v848_v40 = vsub.f32 %v4952_v56, %v840_v39 }
 0x494   : > { %v863_v41 = vmul.f32 1.442695, %v848_v40 }
 0x495   : > { %1207 = vrot.lane.b32.xlu0 %v4918_v27, %s4475_s16  ;;  %v1051_v44 = vpop.permute.xlu1 %1050 }
 0x496   : > { %3978 = vpow2.f32 %v863_v41 }
 0x4a0   : > { %v4982_v42 = vpop.eup %3978 }
 0x4a1   : > { %v886_v43 = vsel %vm816_vm3, %v4982_v42, 0.0 }
 0x4a4   : > { %887 = vadd.xlane.f32.xlu1 %v886_v43 }
 0x4b5   : > { %1209 = vrot.lane.b32.xlu1 %v4918_v27, %s4474_s18 }
 0x4b9   : > { %1260 = vrot.lane.b32.xlu1 %v4916_v25, %s4474_s18  ;;  %s4485_s18 = smov 24  }
 0x4bd   : > { %1258 = vrot.lane.b32.xlu1 %v4916_v25, %s4475_s16  ;;  %s3445_s16 = sshll.u32 %s4554_s11, 10  ;;  %s3189_s11 = scalar_lea.sflag [#allocation5], %s4816_s14 }
 0x4ec   : > { %v867_v45 = vpop.xlane.xlu0 %866 }
 0x4ed   : > { %3980 = vrcp.f32 %v867_v45 }
 0x4ee   : > { %v870_v46 = vpop.xlane.xlu1 %869 }
 0x4ef   : > { %3982 = vrcp.f32 %v870_v46 }
 0x4f4   : > { %v873_v47 = vpop.xlane.xlu0 %872 }
 0x4f5   : > { %3984 = vrcp.f32 %v873_v47 }
 0x4f7   : > { %v3981_v48 = vpop.eup %3980 }
 0x4f8   : > { %v876_v49 = vpop.xlane.xlu1 %875  ;;  %v897_v51 = vmul.f32 %v3981_v48, %v4961_v12 }
 0x4f9   : > { %v3983_v50 = vpop.eup %3982  ;;  %3986 = vrcp.f32 %v876_v49 }
 0x4fa   : > { %v898_v52 = vmul.f32 %v3983_v50, %v3967_v14 }
 0x4fc   : > { %v879_v53 = vpop.xlane.xlu0 %878  ;;  %v882_v54 = vpop.xlane.xlu1 %881  ;;  %v905_v55 = vpack.c.bf16 %v898_v52, %v897_v51 }
 0x4fd   : > { %3988 = vrcp.f32 %v879_v53 }
 0x4fe   : > { %3990 = vrcp.f32 %v882_v54  ;;  %3581 = vmatmul.mubr.msk.bf16.vlgmr.msra.gmra.mrb[12].mxu0 %vm816_vm3, %v905_v55 }
 0x4ff   : > { %3591 = vmatpush3.bf16.msra.mxu0 %v1004_v38  ;;  %3592 = vmatprep.mubr.msk.bf16.mxu0 %vm4471_vm1, %v4470_v8  ;;  %v3985_v56 = vpop.eup %3984 }
 0x500   : > { %3602 = vmatprep.subr.bf16.mxu0 %v4470_v8  ;;  %v899_v58 = vmul.f32 %v3985_v56, %v3969_v24  ;;  %v885_v60 = vpop.xlane.xlu0 %884  ;;  %v1159_v1 = vpop.permute.xlu1 %1158 }
 0x501   : > { %3992 = vrcp.f32 %v885_v60  ;;  %v1164_v18 = vsel %vm618_vm2, %v1159_v1, 0 }
 0x503   : > { %v3987_v57 = vpop.eup %3986 }
 0x504   : > { %v900_v59 = vmul.f32 %v3987_v57, %v3971_v30  ;;  %v1108_v5 = vpop.permute.xlu0 %1107 }
 0x505   : > { %v1113_v0 = vsel %vm618_vm2, %v1108_v5, 0 }
 0x506   : > { %v906_v61 = vpack.c.bf16 %v900_v59, %v899_v58 }
 0x507   : > { %v3989_v62 = vpop.eup %3988 }
 0x508   : > { %v3991_v63 = vpop.eup %3990  ;;  %v901_v3 = vmul.f32 %v3989_v62, %v3975_v33  ;;  %3587 = vmatmul.mubr.msk.bf16.vlgmr.msra.gmra.mrb[12].mxu1 %vm816_vm3, %v906_v61  ;;  %v1106_v10 = vpop.permute.xlu0 %1105 }
 0x509   : > { %v902_v4 = vmul.f32 %v3991_v63, %v3973_v32  ;;  %3597 = vmatpush3.bf16.msra.mxu1 %v1051_v44  ;;  %3598 = vmatprep.mubr.msk.bf16.mxu1 %vm4471_vm1, %v4470_v8 }
 0x50a   : > { %3608 = vmatprep.subr.bf16.mxu1 %v4470_v8 }
 0x50b   : > { %v907_v9 = vpack.c.bf16 %v902_v4, %v901_v3  ;;  %v3993_v13 = vpop.eup %3992 }
 0x50c   : > { %v1157_v12 = vpop.permute.xlu0 %1156  ;;  %v903_v7 = vmul.f32 %v3993_v13, %v4972_v36 }
 0x50d   : > { %3593 = vmatmul.mubr.msk.bf16.vlgmr.msra.gmra.mrb[16].mxu0 %vm816_vm3, %v907_v9 }
 0x50e   : > { %3603 = vmatpush3.bf16.xpose.msra.mxu0 %v1113_v0  ;;  %3604 = vmatprep.mubr.msk.bf16.mxu0 %vm4471_vm1, %v4470_v8 }
 0x50f   : > { %3614 = vmatprep.subr.bf16.mxu0 %v4470_v8 }
 0x510   : > { %v1208_v17 = vpop.permute.xlu0 %1207 }
 0x515   : > { %3605 = vmatmul.mubr.msk.bf16.vlgmr.msra.gmra.mrb[20].mxu0 %vm618_vm2, %v1106_v10 }
 0x516   : > { %3616 = vmatprep.mubr.msk.bf16.mxu0 %vm4471_vm1, %v4470_v8 }
 0x531   : > { %v888_v11 = vpop.xlane.xlu1 %887 }
 0x532   : > { %3994 = vrcp.f32 %v888_v11 }
 0x535   : > { %v1210_v2 = vpop.permute.xlu1 %1209 }
 0x536   : > { %v1215_v6 = vsel %vm618_vm2, %v1210_v2, 0 }
 0x537   : > { %3615 = vmatpush3.bf16.xpose.msra.mxu0 %v1215_v6 }
 0x538   : > { %3626 = vmatprep.subr.bf16.mxu0 %v4470_v8 }
 0x539   : > { %v1261_v20 = vpop.permute.xlu1 %1260 }
 0x53a   : > { %v1266_v22 = vsel %vm618_vm2, %v1261_v20, 0 }
 0x53c   : > { %v3995_v16 = vpop.eup %3994 }
 0x53d   : > { %v904_v14 = vmul.f32 %v3995_v16, %v4982_v42  ;;  %v1259_v23 = vpop.permute.xlu1 %1258 }
 0x53e   : > { %3617 = vmatmul.mubr.msk.bf16.vlgmr.msra.gmra.mrb[24].mxu0 %vm618_vm2, %v1208_v17 }
 0x53f   : > { %v908_v15 = vpack.c.bf16 %v904_v14, %v903_v7  ;;  %3628 = vmatprep.mubr.msk.bf16.mxu0 %vm4471_vm1, %v4470_v8 }
 0x541   : > { %3599 = vmatmul.mubr.msk.bf16.vlgmr.msra.gmra.mrb[16].mxu1 %vm816_vm3, %v908_v15 }
 0x542   : > { %3609 = vmatpush3.bf16.xpose.msra.mxu1 %v1164_v18  ;;  %3610 = vmatprep.mubr.msk.bf16.mxu1 %vm4471_vm1, %v4470_v8 }
 0x543   : > { %3620 = vmatprep.subr.bf16.mxu1 %v4470_v8 }
 0x549   : > { %3611 = vmatmul.mubr.msk.bf16.vlgmr.msra.gmra.mrb[20].mxu1 %vm618_vm2, %v1157_v12 }
 0x54a   : > { %3621 = vmatpush3.bf16.xpose.msra.mxu1 %v1266_v22  ;;  %3622 = vmatprep.mubr.msk.bf16.mxu1 %vm4471_vm1, %v4470_v8 }
 0x54b   : > { %3632 = vmatprep.subr.bf16.mxu1 %v4470_v8 }
 0x551   : > { %3623 = vmatmul.mubr.msk.bf16.vlgmr.msra.gmra.mrb[24].mxu1 %vm618_vm2, %v1259_v23 }
 0x552   : > { %3634 = vmatprep.mubr.msk.bf16.mxu1 %vm4471_vm1, %v4470_v8 }
 0x5d1   : > { %v949_v24 = vpop.f32.mrb[12].mxu0 }
 0x5d2   : > { %v3582_v26 = vpop.f32.mrb[13].mxu0 }
 0x5d3   : > { %v952_v28 = vpop.f32.mrb[14].mxu0 }
 0x5d4   : > { %v1097_v29 = vpack.c.bf16 %v952_v28, %v949_v24  ;;  %v3583_v30 = vpop.f32.mrb[15].mxu0 }
 0x5d6   : > { %1101 = vst.msk [vmem:[#allocation2] sm:$0xff] %vm618_vm2, %v1097_v29 }
 0x5db   : > { %v996_v31 = vpop.f32.mrb[12].mxu1 }
 0x5dc   : > { %v3588_v32 = vpop.f32.mrb[13].mxu1 }
 0x5dd   : > { %v999_v33 = vpop.f32.mrb[14].mxu1 }
 0x5de   : > { %v1098_v34 = vpack.c.bf16 %v999_v33, %v996_v31  ;;  %v3589_v35 = vpop.f32.mrb[15].mxu1 }
 0x5e0   : > { %1102 = vst.msk [vmem:[#allocation2 + $0x8] sm:$0xff] %vm618_vm2, %v1098_v34  ;;  %v1043_v36 = vpop.f32.mrb[16].mxu0 }
 0x5e1   : > { %v3594_v37 = vpop.f32.mrb[17].mxu0 }
 0x5e2   : > { %v1046_v38 = vpop.f32.mrb[18].mxu0 }
 0x5e3   : > { %v1099_v39 = vpack.c.bf16 %v1046_v38, %v1043_v36  ;;  %v3595_v40 = vpop.f32.mrb[19].mxu0 }
 0x5e5   : > { %1103 = vst.msk [vmem:[#allocation2 + $0x10] sm:$0xff] %vm618_vm2, %v1099_v39 }
 0x5e8   : > { %v1149_v41 = vpop.f32.mrb[20].mxu0 }
 0x5e9   : > { %v3606_v42 = vpop.f32.mrb[21].mxu0  ;;  %v1309_v43 = vsel %vm816_vm3, %v1149_v41, -inf }
 0x5ea   : > { %1310 = vmax.xlane.f32.xlu0 %v1309_v43  ;;  %v1152_v44 = vpop.f32.mrb[22].mxu0 }
 0x5eb   : > { %v3607_v45 = vpop.f32.mrb[23].mxu0  ;;  %v1312_v46 = vsel %vm816_vm3, %v1152_v44, -inf }
 0x5ec   : > { %1313 = vmax.xlane.f32.xlu1 %v1312_v46 }
 0x611   : > { %v5031_v47 = vpop.f32.mrb[24].mxu0 }
 0x612   : > { %v3618_v48 = vpop.f32.mrb[25].mxu0  ;;  %v1321_v4 = vsel %vm816_vm3, %v5031_v47, -inf }
 0x613   : > { %v1254_v49 = vpop.f32.mrb[26].mxu0 }
 0x614   : > { %v1090_v50 = vpop.f32.mrb[16].mxu1  ;;  %v3619_v51 = vpop.f32.mrb[27].mxu0  ;;  %v1324_v52 = vsel %vm816_vm3, %v1254_v49, -inf }
 0x615   : > { %1325 = vmax.xlane.f32.xlu1 %v1324_v52  ;;  %v3600_v53 = vpop.f32.mrb[17].mxu1 }
 0x616   : > { %v1093_v54 = vpop.f32.mrb[18].mxu1 }
 0x617   : > { %v1100_v55 = vpack.c.bf16 %v1093_v54, %v1090_v50  ;;  %v3601_v56 = vpop.f32.mrb[19].mxu1 }
 0x619   : > { %1104 = vst.msk [vmem:[#allocation2 + $0x18] sm:$0xff] %vm618_vm2, %v1100_v55 }
 0x61c   : > { %v1200_v57 = vpop.f32.mrb[20].mxu1 }
 0x61d   : > { %v3612_v58 = vpop.f32.mrb[21].mxu1  ;;  %v1315_v59 = vsel %vm816_vm3, %v1200_v57, -inf }
 0x61e   : > { %1316 = vmax.xlane.f32.xlu0 %v1315_v59  ;;  %v1203_v60 = vpop.f32.mrb[22].mxu1 }
 0x61f   : > { %v3613_v61 = vpop.f32.mrb[23].mxu1  ;;  %v1318_v62 = vsel %vm816_vm3, %v1203_v60, -inf }
 0x622   : > { %1319 = vmax.xlane.f32.xlu0 %v1318_v62 }
 0x624   : > { %v1302_v63 = vpop.f32.mrb[24].mxu1 }
 0x625   : > { %v3624_v3 = vpop.f32.mrb[25].mxu1  ;;  %v1327_v0 = vsel %vm816_vm3, %v1302_v63, -inf }
 0x626   : > { %1448 = vrot.lane.b32.xlu1 %v4910_v19, %s4476_s20  ;;  %1322 = vmax.xlane.f32.xlu0 %v1321_v4  ;;  %v5040_v5 = vpop.f32.mrb[26].mxu1 }
 0x627   : > { %v3625_v9 = vpop.f32.mrb[27].mxu1  ;;  %v1330_v10 = vsel %vm816_vm3, %v5040_v5, -inf }
 0x62a   : > { %1495 = vrot.lane.b32.xlu1 %v4918_v27, %s4476_s20  ;;  %1328 = vmax.xlane.f32.xlu0 %v1327_v0 }
 0x640   : > { %1401 = vrot.lane.b32.xlu0 %v4912_v21, %s4476_s20 }
 0x64e   : > { %1331 = vmax.xlane.f32.xlu1 %v1330_v10 }
 0x65f   : > { %1542 = vrot.lane.b32.xlu1 %v4916_v25, %s4476_s20 }
 0x677   : > { %v1311_v1 = vpop.xlane.xlu0 %1310 }
 0x678   : > { %v1333_v11 = vsub.f32 %v1149_v41, %v1311_v1 }
 0x679   : > { %v1314_v2 = vpop.xlane.xlu1 %1313 }
 0x67a   : > { %v1341_v6 = vmul.f32 1.442695, %v1333_v11  ;;  %v1334_v12 = vsub.f32 %v1152_v44, %v1314_v2 }
 0x67c   : > { %3996 = vpow2.f32 %v1341_v6  ;;  %v1343_v13 = vmul.f32 1.442695, %v1334_v12 }
 0x67e   : > { %3998 = vpow2.f32 %v1343_v13 }
 0x686   : > { %v5048_v16 = vpop.eup %3996 }
 0x687   : > { %v1357_v7 = vsel %vm816_vm3, %v5048_v16, 0.0 }
 0x688   : > { %v5052_v17 = vpop.eup %3998  ;;  %1358 = vadd.xlane.f32.xlu0 %v1357_v7 }
 0x689   : > { %v1360_v14 = vsel %vm816_vm3, %v5052_v17, 0.0 }
 0x68a   : > { %1361 = vadd.xlane.f32.xlu1 %v1360_v14 }
 0x6a2   : > { %v1326_v15 = vpop.xlane.xlu1 %1325 }
 0x6a3   : > { %v1338_v23 = vsub.f32 %v1254_v49, %v1326_v15 }
 0x6a5   : > { %v1351_v29 = vmul.f32 1.442695, %v1338_v23 }
 0x6a6   : > { %v1449_v18 = vpop.permute.xlu1 %1448 }
 0x6a7   : > { %3633 = vmatpush3.bf16.msra.mxu1 %v1449_v18 }
 0x6a8   : > { %3644 = vmatprep.subr.bf16.mxu1 %v4470_v8 }
 0x6aa   : > { %v1496_v48 = vpop.permute.xlu1 %1495 }
 0x6ab   : > { %v1317_v20 = vpop.xlane.xlu0 %1316 }
 0x6ac   : > { %v1335_v22 = vsub.f32 %v1200_v57, %v1317_v20 }
 0x6ae   : > { %v1345_v24 = vmul.f32 1.442695, %v1335_v22 }
 0x6af   : > { %v1320_v26 = vpop.xlane.xlu0 %1319 }
 0x6b0   : > { %4000 = vpow2.f32 %v1345_v24  ;;  %v1336_v28 = vsub.f32 %v1203_v60, %v1320_v26 }
 0x6b2   : > { %v1347_v30 = vmul.f32 1.442695, %v1336_v28 }
 0x6b3   : > { %v1323_v31 = vpop.xlane.xlu0 %1322 }
 0x6b4   : > { %4002 = vpow2.f32 %v1347_v30  ;;  %v1337_v32 = vsub.f32 %v5031_v47, %v1323_v31 }
 0x6b5   : > { %4004 = vpow2.f32 %v1351_v29 }
 0x6b6   : > { %v1349_v33 = vmul.f32 1.442695, %v1337_v32 }
 0x6b7   : > { %v1329_v34 = vpop.xlane.xlu0 %1328 }
 0x6b8   : > { %4006 = vpow2.f32 %v1349_v33  ;;  %v1339_v35 = vsub.f32 %v1302_v63, %v1329_v34 }
 0x6ba   : > { %v4001_v36 = vpop.eup %4000  ;;  %v1353_v37 = vmul.f32 1.442695, %v1339_v35 }
 0x6bb   : > { %v1402_v38 = vpop.permute.xlu0 %1401  ;;  %v1363_v39 = vsel %vm816_vm3, %v4001_v36, 0.0 }
 0x6bc   : > { %4008 = vpow2.f32 %v1353_v37  ;;  %1364 = vadd.xlane.f32.xlu0 %v1363_v39  ;;  %3627 = vmatpush3.bf16.msra.mxu0 %v1402_v38 }
 0x6bd   : > { %3638 = vmatprep.subr.bf16.mxu0 %v4470_v8 }
 0x6be   : > { %v4003_v40 = vpop.eup %4002 }
 0x6bf   : > { %v1366_v41 = vsel %vm816_vm3, %v4003_v40, 0.0  ;;  %v4005_v42 = vpop.eup %4004 }
 0x6c0   : > { %1367 = vadd.xlane.f32.xlu1 %v1366_v41  ;;  %v1372_v45 = vsel %vm816_vm3, %v4005_v42, 0.0 }
 0x6c2   : > { %v4007_v43 = vpop.eup %4006 }
 0x6c3   : > { %v1369_v44 = vsel %vm816_vm3, %v4007_v43, 0.0 }
 0x6c4   : > { %1370 = vadd.xlane.f32.xlu0 %v1369_v44  ;;  %1373 = vadd.xlane.f32.xlu1 %v1372_v45 }
 0x6c6   : > { %v5063_v46 = vpop.eup %4008 }
 0x6c7   : > { %v1375_v47 = vsel %vm816_vm3, %v5063_v46, 0.0 }
 0x6c8   : > { %1376 = vadd.xlane.f32.xlu0 %v1375_v47 }
 0x6d5   : > { %1667 = vrot.lane.b32.xlu1 %v4910_v19, %s4477_s15 }
 0x6db   : > { %v1332_v49 = vpop.xlane.xlu1 %1331 }
 0x6dc   : > { %v1340_v50 = vsub.f32 %v5040_v5, %v1332_v49 }
 0x6de   : > { %1616 = vrot.lane.b32.xlu0 %v4912_v21, %s4477_s15  ;;  %v1355_v51 = vmul.f32 1.442695, %v1340_v50 }
 0x6df   : > { %v1543_v54 = vpop.permute.xlu1 %1542 }
 0x6e0   : > { %4010 = vpow2.f32 %v1355_v51 }
 0x6e2   : > { %1614 = vrot.lane.b32.xlu0 %v4912_v21, %s4478_s13 }
 0x6e6   : > { %1665 = vrot.lane.b32.xlu0 %v4910_v19, %s4478_s13 }
 0x6ea   : > { %1716 = vrot.lane.b32.xlu0 %v4918_v27, %s4478_s13  ;;  %v5073_v52 = vpop.eup %4010 }
 0x6eb   : > { %v1378_v53 = vsel %vm816_vm3, %v5073_v52, 0.0 }
 0x6f9   : > { %1379 = vadd.xlane.f32.xlu1 %v1378_v53 }
 0x70a   : > { %1718 = vrot.lane.b32.xlu1 %v4918_v27, %s4477_s15 }
 0x70e   : > { %1769 = vrot.lane.b32.xlu1 %v4916_v25, %s4477_s15 }
 0x712   : > { %1767 = vrot.lane.b32.xlu1 %v4916_v25, %s4478_s13  ;;  %s5446_s13 = scalar_lea.hbm %s5505_s8, %s3445_s16 }
 0x715   : > { %v1359_v55 = vpop.xlane.xlu0 %1358 }
 0x716   : > { %4012 = vrcp.f32 %v1359_v55 }
 0x717   : > { %v1362_v56 = vpop.xlane.xlu1 %1361 }
 0x718   : > { %4014 = vrcp.f32 %v1362_v56 }
 0x720   : > { %v4013_v57 = vpop.eup %4012 }
 0x721   : > { %v1389_v59 = vmul.f32 %v4013_v57, %v5048_v16 }
 0x722   : > { %v4015_v58 = vpop.eup %4014 }
 0x723   : > { %v1390_v60 = vmul.f32 %v4015_v58, %v5052_v17 }
 0x725   : > { %v1397_v61 = vpack.c.bf16 %v1390_v60, %v1389_v59 }
 0x727   : > { %3629 = vmatmul.mubr.msk.bf16.vlgmr.msra.gmra.mrb[28].mxu0 %vm816_vm3, %v1397_v61 }
 0x728   : > { %3639 = vmatpush3.bf16.msra.mxu0 %v1496_v48  ;;  %3640 = vmatprep.mubr.msk.bf16.mxu0 %vm4471_vm1, %v4470_v8 }
 0x729   : > { %3650 = vmatprep.subr.bf16.mxu0 %v4470_v8 }
 0x749   : > { %v1365_v62 = vpop.xlane.xlu0 %1364 }
 0x74a   : > { %4016 = vrcp.f32 %v1365_v62 }
 0x74d   : > { %v1368_v63 = vpop.xlane.xlu1 %1367 }
 0x74e   : > { %4018 = vrcp.f32 %v1368_v63 }
 0x751   : > { %v1371_v3 = vpop.xlane.xlu0 %1370  ;;  %v1374_v4 = vpop.xlane.xlu1 %1373 }
 0x752   : > { %4020 = vrcp.f32 %v1371_v3 }
 0x753   : > { %4022 = vrcp.f32 %v1374_v4 }
 0x754   : > { %v4017_v5 = vpop.eup %4016 }
 0x755   : > { %v1391_v0 = vmul.f32 %v4017_v5, %v4001_v36  ;;  %v1377_v1 = vpop.xlane.xlu0 %1376  ;;  %v1668_v15 = vpop.permute.xlu1 %1667 }
 0x756   : > { %4024 = vrcp.f32 %v1377_v1  ;;  %v1673_v32 = vsel %vm618_vm2, %v1668_v15, 0 }
 0x758   : > { %v4019_v9 = vpop.eup %4018 }
 0x759   : > { %v1392_v10 = vmul.f32 %v4019_v9, %v4003_v40  ;;  %v1617_v16 = vpop.permute.xlu0 %1616 }
 0x75a   : > { %v1622_v17 = vsel %vm618_vm2, %v1617_v16, 0 }
 0x75b   : > { %v1398_v11 = vpack.c.bf16 %v1392_v10, %v1391_v0 }
 0x75c   : > { %v4021_v2 = vpop.eup %4020 }
 0x75d   : > { %v4023_v6 = vpop.eup %4022  ;;  %v1393_v12 = vmul.f32 %v4021_v2, %v4007_v43  ;;  %3635 = vmatmul.mubr.msk.bf16.vlgmr.msra.gmra.mrb[28].mxu1 %vm816_vm3, %v1398_v11  ;;  %v1615_v14 = vpop.permute.xlu0 %1614 }
 0x75e   : > { %v1394_v13 = vmul.f32 %v4023_v6, %v4005_v42  ;;  %3645 = vmatpush3.bf16.msra.mxu1 %v1543_v54  ;;  %3646 = vmatprep.mubr.msk.bf16.mxu1 %vm4471_vm1, %v4470_v8 }
 0x75f   : > { %3656 = vmatprep.subr.bf16.mxu1 %v4470_v8 }
 0x760   : > { %v1399_v7 = vpack.c.bf16 %v1394_v13, %v1393_v12  ;;  %v4025_v24 = vpop.eup %4024 }
 0x761   : > { %v1666_v23 = vpop.permute.xlu0 %1665  ;;  %v1395_v28 = vmul.f32 %v4025_v24, %v5063_v46 }
 0x762   : > { %3641 = vmatmul.mubr.msk.bf16.vlgmr.msra.gmra.mrb[32].mxu0 %vm816_vm3, %v1399_v7 }
 0x763   : > { %3651 = vmatpush3.bf16.xpose.msra.mxu0 %v1622_v17  ;;  %3652 = vmatprep.mubr.msk.bf16.mxu0 %vm4471_vm1, %v4470_v8 }
 0x764   : > { %3662 = vmatprep.subr.bf16.mxu0 %v4470_v8 }
 0x765   : > { %v1717_v29 = vpop.permute.xlu0 %1716 }
 0x76a   : > { %3653 = vmatmul.mubr.msk.bf16.vlgmr.msra.gmra.mrb[36].mxu0 %vm618_vm2, %v1615_v14 }
 0x76b   : > { %3664 = vmatprep.mubr.msk.bf16.mxu0 %vm4471_vm1, %v4470_v8 }
 0x786   : > { %v1380_v18 = vpop.xlane.xlu1 %1379 }
 0x787   : > { %4026 = vrcp.f32 %v1380_v18 }
 0x78a   : > { %v1719_v20 = vpop.permute.xlu1 %1718 }
 0x78b   : > { %v1724_v22 = vsel %vm618_vm2, %v1719_v20, 0 }
 0x78c   : > { %3663 = vmatpush3.bf16.xpose.msra.mxu0 %v1724_v22 }
 0x78d   : > { %3674 = vmatprep.subr.bf16.mxu0 %v4470_v8 }
 0x78e   : > { %v1770_v33 = vpop.permute.xlu1 %1769 }
 0x78f   : > { %v1775_v34 = vsel %vm618_vm2, %v1770_v33, 0 }
 0x791   : > { %v4027_v26 = vpop.eup %4026 }
 0x792   : > { %v1396_v30 = vmul.f32 %v4027_v26, %v5073_v52  ;;  %v1768_v35 = vpop.permute.xlu1 %1767 }
 0x793   : > { %3665 = vmatmul.mubr.msk.bf16.vlgmr.msra.gmra.mrb[40].mxu0 %vm618_vm2, %v1717_v29 }
 0x794   : > { %v1400_v31 = vpack.c.bf16 %v1396_v30, %v1395_v28  ;;  %3676 = vmatprep.mubr.msk.bf16.mxu0 %vm4471_vm1, %v4470_v8 }
 0x796   : > { %3647 = vmatmul.mubr.msk.bf16.vlgmr.msra.gmra.mrb[32].mxu1 %vm816_vm3, %v1400_v31 }
 0x797   : > { %3657 = vmatpush3.bf16.xpose.msra.mxu1 %v1673_v32  ;;  %3658 = vmatprep.mubr.msk.bf16.mxu1 %vm4471_vm1, %v4470_v8 }
 0x798   : > { %3668 = vmatprep.subr.bf16.mxu1 %v4470_v8 }
 0x79e   : > { %3659 = vmatmul.mubr.msk.bf16.vlgmr.msra.gmra.mrb[36].mxu1 %vm618_vm2, %v1666_v23 }
 0x79f   : > { %3669 = vmatpush3.bf16.xpose.msra.mxu1 %v1775_v34  ;;  %3670 = vmatprep.mubr.msk.bf16.mxu1 %vm4471_vm1, %v4470_v8 }
 0x7a0   : > { %3680 = vmatprep.subr.bf16.mxu1 %v4470_v8 }
 0x7a6   : > { %3671 = vmatmul.mubr.msk.bf16.vlgmr.msra.gmra.mrb[40].mxu1 %vm618_vm2, %v1768_v35 }
 0x7a7   : > { %3682 = vmatprep.mubr.msk.bf16.mxu1 %vm4471_vm1, %v4470_v8 }
 0x7fa   : > { %v5118_v36 = vpop.f32.mrb[28].mxu0 }
 0x7fb   : > { %v3630_v37 = vpop.f32.mrb[29].mxu0 }
 0x7fc   : > { %v5120_v38 = vpop.f32.mrb[30].mxu0 }
 0x7fd   : > { %v1589_v39 = vpack.c.bf16 %v5120_v38, %v5118_v36  ;;  %v3631_v40 = vpop.f32.mrb[31].mxu0 }
 0x830   : > { %v5124_v41 = vpop.f32.mrb[28].mxu1 }
 0x831   : > { %v3636_v42 = vpop.f32.mrb[29].mxu1 }
 0x832   : > { %v5126_v43 = vpop.f32.mrb[30].mxu1 }
 0x833   : > { %v1590_v44 = vpack.c.bf16 %v5126_v43, %v5124_v41  ;;  %v3637_v45 = vpop.f32.mrb[31].mxu1 }
 0x835   : > { %v5130_v46 = vpop.f32.mrb[32].mxu0 }
 0x836   : > { %v3642_v47 = vpop.f32.mrb[33].mxu0 }
 0x837   : > { %v5132_v48 = vpop.f32.mrb[34].mxu0 }
 0x838   : > { %v1591_v49 = vpack.c.bf16 %v5132_v48, %v5130_v46  ;;  %v3643_v50 = vpop.f32.mrb[35].mxu0 }
 0x83d   : > { %v1658_v51 = vpop.f32.mrb[36].mxu0 }
 0x83e   : > { %v3654_v52 = vpop.f32.mrb[37].mxu0  ;;  %v1818_v53 = vsel %vm816_vm3, %v1658_v51, -inf }
 0x83f   : > { %1819 = vmax.xlane.f32.xlu0 %v1818_v53  ;;  %v1661_v54 = vpop.f32.mrb[38].mxu0 }
 0x840   : > { %v3655_v55 = vpop.f32.mrb[39].mxu0  ;;  %v1821_v56 = vsel %vm816_vm3, %v1661_v54, -inf }
 0x841   : > { %1822 = vmax.xlane.f32.xlu1 %v1821_v56 }
 0x866   : > { %v5138_v57 = vpop.f32.mrb[40].mxu0 }
 0x867   : > { %v3666_v58 = vpop.f32.mrb[41].mxu0  ;;  %v1830_v13 = vsel %vm816_vm3, %v5138_v57, -inf }
 0x868   : > { %v1763_v59 = vpop.f32.mrb[42].mxu0 }
 0x869   : > { %v5140_v60 = vpop.f32.mrb[32].mxu1  ;;  %v3667_v61 = vpop.f32.mrb[43].mxu0  ;;  %v1833_v62 = vsel %vm816_vm3, %v1763_v59, -inf }
 0x86a   : > { %1834 = vmax.xlane.f32.xlu1 %v1833_v62  ;;  %v3648_v63 = vpop.f32.mrb[33].mxu1 }
 0x86b   : > { %v5143_v3 = vpop.f32.mrb[34].mxu1 }
 0x86c   : > { %v1592_v4 = vpack.c.bf16 %v5143_v3, %v5140_v60  ;;  %v3649_v5 = vpop.f32.mrb[35].mxu1 }
 0x871   : > { %v1709_v9 = vpop.f32.mrb[36].mxu1 }
 0x872   : > { %v3660_v0 = vpop.f32.mrb[37].mxu1  ;;  %v1824_v10 = vsel %vm816_vm3, %v1709_v9, -inf }
 0x873   : > { %1825 = vmax.xlane.f32.xlu0 %v1824_v10  ;;  %v1712_v1 = vpop.f32.mrb[38].mxu1 }
 0x874   : > { %v3661_v11 = vpop.f32.mrb[39].mxu1  ;;  %v1827_v2 = vsel %vm816_vm3, %v1712_v1, -inf }
 0x877   : > { %1828 = vmax.xlane.f32.xlu0 %v1827_v2 }
 0x879   : > { %v1811_v6 = vpop.f32.mrb[40].mxu1 }
 0x87a   : > { %v3672_v12 = vpop.f32.mrb[41].mxu1  ;;  %v1836_v17 = vsel %vm816_vm3, %v1811_v6, -inf }
 0x87b   : > { %1957 = vrot.lane.b32.xlu1 %v4910_v19, %s4479_s24  ;;  %1831 = vmax.xlane.f32.xlu0 %v1830_v13  ;;  %v5152_v16 = vpop.f32.mrb[42].mxu1 }
 0x87c   : > { %v3673_v7 = vpop.f32.mrb[43].mxu1  ;;  %v1839_v14 = vsel %vm816_vm3, %v5152_v16, -inf }
 0x87f   : > { %2004 = vrot.lane.b32.xlu1 %v4918_v27, %s4479_s24  ;;  %1837 = vmax.xlane.f32.xlu0 %v1836_v17 }
 0x895   : > { %1910 = vrot.lane.b32.xlu0 %v4912_v21, %s4479_s24 }
 0x8a3   : > { %1840 = vmax.xlane.f32.xlu1 %v1839_v14 }
 0x8b4   : > { %2051 = vrot.lane.b32.xlu1 %v4916_v25, %s4479_s24 }
 0x8cc   : > { %v1820_v15 = vpop.xlane.xlu0 %1819 }
 0x8cd   : > { %v1842_v18 = vsub.f32 %v1658_v51, %v1820_v15 }
 0x8ce   : > { %v1823_v20 = vpop.xlane.xlu1 %1822 }
 0x8cf   : > { %v1850_v22 = vmul.f32 1.442695, %v1842_v18  ;;  %v1843_v23 = vsub.f32 %v1661_v54, %v1823_v20 }
 0x8d1   : > { %4028 = vpow2.f32 %v1850_v22  ;;  %v1852_v24 = vmul.f32 1.442695, %v1843_v23 }
 0x8d3   : > { %4030 = vpow2.f32 %v1852_v24 }
 0x8db   : > { %v5160_v26 = vpop.eup %4028 }
 0x8dc   : > { %v1866_v28 = vsel %vm816_vm3, %v5160_v26, 0.0 }
 0x8dd   : > { %v5164_v29 = vpop.eup %4030  ;;  %1867 = vadd.xlane.f32.xlu0 %v1866_v28 }
 0x8de   : > { %v1869_v30 = vsel %vm816_vm3, %v5164_v29, 0.0 }
 0x8df   : > { %1870 = vadd.xlane.f32.xlu1 %v1869_v30 }
 0x8f7   : > { %v1835_v31 = vpop.xlane.xlu1 %1834 }
 0x8f8   : > { %v1847_v35 = vsub.f32 %v1763_v59, %v1835_v31 }
 0x8fa   : > { %v1860_v45 = vmul.f32 1.442695, %v1847_v35 }
 0x8fb   : > { %v1958_v32 = vpop.permute.xlu1 %1957 }
 0x8fc   : > { %3681 = vmatpush3.bf16.msra.mxu1 %v1958_v32 }
 0x8fd   : > { %3692 = vmatprep.subr.bf16.mxu1 %v4470_v8 }
 0x900   : > { %v1826_v33 = vpop.xlane.xlu0 %1825 }
 0x901   : > { %v1844_v34 = vsub.f32 %v1709_v9, %v1826_v33 }
 0x903   : > { %v1854_v37 = vmul.f32 1.442695, %v1844_v34 }
 0x904   : > { %v1829_v40 = vpop.xlane.xlu0 %1828 }
 0x905   : > { %4032 = vpow2.f32 %v1854_v37  ;;  %v1845_v42 = vsub.f32 %v1712_v1, %v1829_v40  ;;  %v2005_v1 = vpop.permute.xlu1 %2004 }
 0x907   : > { %v1856_v47 = vmul.f32 1.442695, %v1845_v42 }
 0x908   : > { %v1832_v50 = vpop.xlane.xlu0 %1831 }
 0x909   : > { %4034 = vpow2.f32 %v1856_v47  ;;  %v1846_v51 = vsub.f32 %v5138_v57, %v1832_v50 }
 0x90a   : > { %4036 = vpow2.f32 %v1860_v45 }
 0x90b   : > { %v1858_v52 = vmul.f32 1.442695, %v1846_v51 }
 0x90c   : > { %v1838_v53 = vpop.xlane.xlu0 %1837 }
 0x90d   : > { %4038 = vpow2.f32 %v1858_v52  ;;  %v1848_v54 = vsub.f32 %v1811_v6, %v1838_v53 }
 0x90f   : > { %v4033_v55 = vpop.eup %4032  ;;  %v1862_v56 = vmul.f32 1.442695, %v1848_v54 }
 0x910   : > { %v1911_v58 = vpop.permute.xlu0 %1910  ;;  %v1872_v59 = vsel %vm816_vm3, %v4033_v55, 0.0 }
 0x911   : > { %4040 = vpow2.f32 %v1862_v56  ;;  %1873 = vadd.xlane.f32.xlu0 %v1872_v59  ;;  %3675 = vmatpush3.bf16.msra.mxu0 %v1911_v58 }
 0x912   : > { %3686 = vmatprep.subr.bf16.mxu0 %v4470_v8 }
 0x913   : > { %v4035_v61 = vpop.eup %4034 }
 0x914   : > { %v1875_v62 = vsel %vm816_vm3, %v4035_v61, 0.0  ;;  %v4037_v63 = vpop.eup %4036 }
 0x915   : > { %1876 = vadd.xlane.f32.xlu1 %v1875_v62  ;;  %v1881_v9 = vsel %vm816_vm3, %v4037_v63, 0.0 }
 0x917   : > { %v4039_v57 = vpop.eup %4038 }
 0x918   : > { %v1878_v5 = vsel %vm816_vm3, %v4039_v57, 0.0 }
 0x919   : > { %1879 = vadd.xlane.f32.xlu0 %v1878_v5  ;;  %1882 = vadd.xlane.f32.xlu1 %v1881_v9 }
 0x91b   : > { %v5175_v0 = vpop.eup %4040 }
 0x91c   : > { %v1884_v10 = vsel %vm816_vm3, %v5175_v0, 0.0 }
 0x91d   : > { %1885 = vadd.xlane.f32.xlu0 %v1884_v10 }
 0x92a   : > { %2176 = vrot.lane.b32.xlu1 %v4910_v19, %s4480_s1 }
 0x930   : > { %v1841_v11 = vpop.xlane.xlu1 %1840 }
 0x931   : > { %v1849_v2 = vsub.f32 %v5152_v16, %v1841_v11 }
 0x933   : > { %2125 = vrot.lane.b32.xlu0 %v4912_v21, %s4480_s1  ;;  %v1864_v6 = vmul.f32 1.442695, %v1849_v2 }
 0x934   : > { %v2052_v7 = vpop.permute.xlu1 %2051 }
 0x935   : > { %4042 = vpow2.f32 %v1864_v6 }
 0x937   : > { %2123 = vrot.lane.b32.xlu0 %v4912_v21, %s4481_s25 }
 0x93b   : > { %2174 = vrot.lane.b32.xlu0 %v4910_v19, %s4481_s25 }
 0x93f   : > { %2225 = vrot.lane.b32.xlu0 %v4918_v27, %s4481_s25  ;;  %v5185_v12 = vpop.eup %4042 }
 0x940   : > { %v1887_v13 = vsel %vm816_vm3, %v5185_v12, 0.0 }
 0x94e   : > { %1888 = vadd.xlane.f32.xlu1 %v1887_v13 }
 0x95f   : > { %2227 = vrot.lane.b32.xlu1 %v4918_v27, %s4480_s1 }
 0x963   : > { %2278 = vrot.lane.b32.xlu1 %v4916_v25, %s4480_s1  ;;  %s4486_s1 = smov [#allocation17]  }
 0x967   : > { %2276 = vrot.lane.b32.xlu1 %v4916_v25, %s4481_s25  ;;  %s4378_s25 = sshll.u32 %s4486_s1, 4  ;;  %s4379_s25 = int_to_ptr.vmem [resolvable:$false] %s4378_s25 }
 0x96a   : > { %v1868_v16 = vpop.xlane.xlu0 %1867 }
 0x96b   : > { %4044 = vrcp.f32 %v1868_v16 }
 0x96c   : > { %v1871_v17 = vpop.xlane.xlu1 %1870 }
 0x96d   : > { %4046 = vrcp.f32 %v1871_v17 }
 0x975   : > { %v4045_v14 = vpop.eup %4044 }
 0x976   : > { %v1898_v18 = vmul.f32 %v4045_v14, %v5160_v26 }
 0x977   : > { %v4047_v15 = vpop.eup %4046 }
 0x978   : > { %v1899_v20 = vmul.f32 %v4047_v15, %v5164_v29 }
 0x97a   : > { %v1906_v22 = vpack.c.bf16 %v1899_v20, %v1898_v18 }
 0x97c   : > { %3677 = vmatmul.mubr.msk.bf16.vlgmr.msra.gmra.mrb[44].mxu0 %vm816_vm3, %v1906_v22 }
 0x97d   : > { %3687 = vmatpush3.bf16.msra.mxu0 %v2005_v1  ;;  %3688 = vmatprep.mubr.msk.bf16.mxu0 %vm4471_vm1, %v4470_v8 }
 0x97e   : > { %3698 = vmatprep.subr.bf16.mxu0 %v4470_v8 }
 0x99e   : > { %v1874_v23 = vpop.xlane.xlu0 %1873 }
 0x99f   : > { %4048 = vrcp.f32 %v1874_v23 }
 0x9a2   : > { %v1877_v24 = vpop.xlane.xlu1 %1876 }
 0x9a3   : > { %4050 = vrcp.f32 %v1877_v24 }
 0x9a6   : > { %v1880_v28 = vpop.xlane.xlu0 %1879  ;;  %v1883_v30 = vpop.xlane.xlu1 %1882 }
 0x9a7   : > { %4052 = vrcp.f32 %v1880_v28 }
 0x9a8   : > { %4054 = vrcp.f32 %v1883_v30 }
 0x9a9   : > { %v4049_v26 = vpop.eup %4048 }
 0x9aa   : > { %v1900_v29 = vmul.f32 %v4049_v26, %v4033_v55  ;;  %v1886_v33 = vpop.xlane.xlu0 %1885  ;;  %v2177_v52 = vpop.permute.xlu1 %2176 }
 0x9ab   : > { %4056 = vrcp.f32 %v1886_v33  ;;  %v2182_v5 = vsel %vm618_vm2, %v2177_v52, 0 }
 0x9ad   : > { %v4051_v31 = vpop.eup %4050 }
 0x9ae   : > { %v1901_v32 = vmul.f32 %v4051_v31, %v4035_v61  ;;  %v2126_v45 = vpop.permute.xlu0 %2125 }
 0x9af   : > { %v2131_v50 = vsel %vm618_vm2, %v2126_v45, 0 }
 0x9b0   : > { %v1907_v34 = vpack.c.bf16 %v1901_v32, %v1900_v29 }
 0x9b1   : > { %v4053_v35 = vpop.eup %4052 }
 0x9b2   : > { %v4055_v37 = vpop.eup %4054  ;;  %v1902_v40 = vmul.f32 %v4053_v35, %v4039_v57  ;;  %3683 = vmatmul.mubr.msk.bf16.vlgmr.msra.gmra.mrb[44].mxu1 %vm816_vm3, %v1907_v34  ;;  %v2124_v51 = vpop.permute.xlu0 %2123 }
 0x9b3   : > { %v1903_v42 = vmul.f32 %v4055_v37, %v4037_v63  ;;  %3693 = vmatpush3.bf16.msra.mxu1 %v2052_v7  ;;  %3694 = vmatprep.mubr.msk.bf16.mxu1 %vm4471_vm1, %v4470_v8 }
 0x9b4   : > { %3704 = vmatprep.subr.bf16.mxu1 %v4470_v8 }
 0x9b5   : > { %v1908_v47 = vpack.c.bf16 %v1903_v42, %v1902_v40  ;;  %v4057_v58 = vpop.eup %4056 }
 0x9b6   : > { %v2175_v56 = vpop.permute.xlu0 %2174  ;;  %v1904_v61 = vmul.f32 %v4057_v58, %v5175_v0 }
 0x9b7   : > { %3689 = vmatmul.mubr.msk.bf16.vlgmr.msra.gmra.mrb[48].mxu0 %vm816_vm3, %v1908_v47 }
 0x9b8   : > { %3699 = vmatpush3.bf16.xpose.msra.mxu0 %v2131_v50  ;;  %3700 = vmatprep.mubr.msk.bf16.mxu0 %vm4471_vm1, %v4470_v8 }
 0x9b9   : > { %3710 = vmatprep.subr.bf16.mxu0 %v4470_v8 }
 0x9ba   : > { %v2226_v62 = vpop.permute.xlu0 %2225 }
 0x9bf   : > { %3701 = vmatmul.mubr.msk.bf16.vlgmr.msra.gmra.mrb[52].mxu0 %vm618_vm2, %v2124_v51 }
 0x9c0   : > { %3712 = vmatprep.mubr.msk.bf16.mxu0 %vm4471_vm1, %v4470_v8 }
 0x9db   : > { %v1889_v53 = vpop.xlane.xlu1 %1888 }
 0x9dc   : > { %4058 = vrcp.f32 %v1889_v53 }
 0x9df   : > { %v2228_v54 = vpop.permute.xlu1 %2227 }
 0x9e0   : > { %v2233_v55 = vsel %vm618_vm2, %v2228_v54, 0 }
 0x9e1   : > { %3711 = vmatpush3.bf16.xpose.msra.mxu0 %v2233_v55 }
 0x9e2   : > { %3722 = vmatprep.subr.bf16.mxu0 %v4470_v8 }
 0x9e3   : > { %v2279_v9 = vpop.permute.xlu1 %2278 }
 0x9e4   : > { %v2284_v0 = vsel %vm618_vm2, %v2279_v9, 0 }
 0x9e6   : > { %v4059_v59 = vpop.eup %4058 }
 0x9e7   : > { %v1905_v63 = vmul.f32 %v4059_v59, %v5185_v12  ;;  %v2277_v10 = vpop.permute.xlu1 %2276 }
 0x9e8   : > { %3713 = vmatmul.mubr.msk.bf16.vlgmr.msra.gmra.mrb[56].mxu0 %vm618_vm2, %v2226_v62 }
 0x9e9   : > { %v1909_v57 = vpack.c.bf16 %v1905_v63, %v1904_v61  ;;  %3724 = vmatprep.mubr.msk.bf16.mxu0 %vm4471_vm1, %v4470_v8 }
 0x9eb   : > { %3695 = vmatmul.mubr.msk.bf16.vlgmr.msra.gmra.mrb[48].mxu1 %vm816_vm3, %v1909_v57 }
 0x9ec   : > { %3705 = vmatpush3.bf16.xpose.msra.mxu1 %v2182_v5  ;;  %3706 = vmatprep.mubr.msk.bf16.mxu1 %vm4471_vm1, %v4470_v8 }
 0x9ed   : > { %3716 = vmatprep.subr.bf16.mxu1 %v4470_v8 }
 0x9f3   : > { %3707 = vmatmul.mubr.msk.bf16.vlgmr.msra.gmra.mrb[52].mxu1 %vm618_vm2, %v2175_v56 }
 0x9f4   : > { %3717 = vmatpush3.bf16.xpose.msra.mxu1 %v2284_v0  ;;  %3718 = vmatprep.mubr.msk.bf16.mxu1 %vm4471_vm1, %v4470_v8 }
 0x9f5   : > { %3728 = vmatprep.subr.bf16.mxu1 %v4470_v8 }
 0x9fb   : > { %3719 = vmatmul.mubr.msk.bf16.vlgmr.msra.gmra.mrb[56].mxu1 %vm618_vm2, %v2277_v10 }
 0x9fc   : > { %3730 = vmatprep.mubr.msk.bf16.mxu1 %vm4471_vm1, %v4470_v8 }
 0xa4f   : > { %v5230_v1 = vpop.f32.mrb[44].mxu0 }
 0xa50   : > { %v3678_v11 = vpop.f32.mrb[45].mxu0 }
 0xa51   : > { %v5232_v2 = vpop.f32.mrb[46].mxu0 }
 0xa52   : > { %v2098_v6 = vpack.c.bf16 %v5232_v2, %v5230_v1  ;;  %v3679_v12 = vpop.f32.mrb[47].mxu0 }
 0xa85   : > { %v5236_v13 = vpop.f32.mrb[44].mxu1 }
 0xa86   : > { %v3684_v7 = vpop.f32.mrb[45].mxu1 }
 0xa87   : > { %v5238_v16 = vpop.f32.mrb[46].mxu1 }
 0xa88   : > { %v2099_v17 = vpack.c.bf16 %v5238_v16, %v5236_v13  ;;  %v3685_v14 = vpop.f32.mrb[47].mxu1 }
 0xa8a   : > { %v5242_v15 = vpop.f32.mrb[48].mxu0 }
 0xa8b   : > { %v3690_v18 = vpop.f32.mrb[49].mxu0 }
 0xa8c   : > { %v5244_v20 = vpop.f32.mrb[50].mxu0 }
 0xa8d   : > { %v2100_v22 = vpack.c.bf16 %v5244_v20, %v5242_v15  ;;  %v3691_v23 = vpop.f32.mrb[51].mxu0 }
 0xa92   : > { %v2167_v24 = vpop.f32.mrb[52].mxu0 }
 0xa93   : > { %v3702_v28 = vpop.f32.mrb[53].mxu0  ;;  %v2327_v30 = vsel %vm816_vm3, %v2167_v24, -inf }
 0xa94   : > { %2328 = vmax.xlane.f32.xlu0 %v2327_v30  ;;  %v2170_v26 = vpop.f32.mrb[54].mxu0 }
 0xa95   : > { %v3703_v31 = vpop.f32.mrb[55].mxu0  ;;  %v2330_v29 = vsel %vm816_vm3, %v2170_v26, -inf }
 0xa96   : > { %2331 = vmax.xlane.f32.xlu1 %v2330_v29 }
 0xabb   : > { %v2269_v32 = vpop.f32.mrb[56].mxu0 }
 0xabc   : > { %v3714_v33 = vpop.f32.mrb[57].mxu0  ;;  %v2339_v61 = vsel %vm816_vm3, %v2269_v32, -inf }
 0xabd   : > { %v2272_v34 = vpop.f32.mrb[58].mxu0 }
 0xabe   : > { %v5250_v35 = vpop.f32.mrb[48].mxu1  ;;  %v3715_v37 = vpop.f32.mrb[59].mxu0  ;;  %v2342_v40 = vsel %vm816_vm3, %v2272_v34, -inf }
 0xabf   : > { %2343 = vmax.xlane.f32.xlu1 %v2342_v40  ;;  %v3696_v42 = vpop.f32.mrb[49].mxu1 }
 0xac0   : > { %v5253_v45 = vpop.f32.mrb[50].mxu1 }
 0xac1   : > { %v2101_v47 = vpack.c.bf16 %v5253_v45, %v5250_v35  ;;  %v3697_v50 = vpop.f32.mrb[51].mxu1 }
 0xac6   : > { %v2218_v51 = vpop.f32.mrb[52].mxu1 }
 0xac7   : > { %v3708_v52 = vpop.f32.mrb[53].mxu1  ;;  %v2333_v53 = vsel %vm816_vm3, %v2218_v51, -inf }
 0xac8   : > { %2334 = vmax.xlane.f32.xlu0 %v2333_v53  ;;  %v2221_v54 = vpop.f32.mrb[54].mxu1 }
 0xac9   : > { %v3709_v55 = vpop.f32.mrb[55].mxu1  ;;  %v2336_v56 = vsel %vm816_vm3, %v2221_v54, -inf }
 0xacc   : > { %2337 = vmax.xlane.f32.xlu0 %v2336_v56 }
 0xace   : > { %v2320_v58 = vpop.f32.mrb[56].mxu1 }
 0xacf   : > { %v3720_v59 = vpop.f32.mrb[57].mxu1  ;;  %v2345_v5 = vsel %vm816_vm3, %v2320_v58, -inf }
 0xad0   : > { %2340 = vmax.xlane.f32.xlu0 %v2339_v61  ;;  %v5260_v62 = vpop.f32.mrb[58].mxu1 }
 0xad1   : > { %v3721_v63 = vpop.f32.mrb[59].mxu1  ;;  %v2348_v57 = vsel %vm816_vm3, %v5260_v62, -inf }
 0xad2   : > { %2349 = vmax.xlane.f32.xlu1 %v2348_v57 }
 0xad4   : > { %2346 = vmax.xlane.f32.xlu0 %v2345_v5 }
 0xb21   : > { %v2329_v9 = vpop.xlane.xlu0 %2328 }
 0xb22   : > { %v2351_v0 = vsub.f32 %v2167_v24, %v2329_v9 }
 0xb23   : > { %v2332_v10 = vpop.xlane.xlu1 %2331 }
 0xb24   : > { %v2359_v11 = vmul.f32 1.442695, %v2351_v0  ;;  %v2352_v12 = vsub.f32 %v2170_v26, %v2332_v10 }
 0xb26   : > { %4060 = vpow2.f32 %v2359_v11  ;;  %v2361_v7 = vmul.f32 1.442695, %v2352_v12 }
 0xb28   : > { %4062 = vpow2.f32 %v2361_v7 }
 0xb30   : > { %v5265_v14 = vpop.eup %4060 }
 0xb31   : > { %v2375_v18 = vsel %vm816_vm3, %v5265_v14, 0.0 }
 0xb32   : > { %v5269_v23 = vpop.eup %4062  ;;  %2376 = vadd.xlane.f32.xlu0 %v2375_v18 }
 0xb33   : > { %v2378_v28 = vsel %vm816_vm3, %v5269_v23, 0.0 }
 0xb34   : > { %2379 = vadd.xlane.f32.xlu1 %v2378_v28 }
 0xb4c   : > { %v2344_v30 = vpop.xlane.xlu1 %2343 }
 0xb4d   : > { %v2356_v29 = vsub.f32 %v2272_v34, %v2344_v30 }
 0xb4f   : > { %v2369_v40 = vmul.f32 1.442695, %v2356_v29 }
 0xb55   : > { %v2335_v24 = vpop.xlane.xlu0 %2334 }
 0xb56   : > { %v2353_v31 = vsub.f32 %v2218_v51, %v2335_v24 }
 0xb58   : > { %v2363_v26 = vmul.f32 1.442695, %v2353_v31 }
 0xb59   : > { %v2338_v33 = vpop.xlane.xlu0 %2337 }
 0xb5a   : > { %4064 = vpow2.f32 %v2363_v26  ;;  %v2354_v37 = vsub.f32 %v2221_v54, %v2338_v33 }
 0xb5c   : > { %v2365_v42 = vmul.f32 1.442695, %v2354_v37 }
 0xb5d   : > { %v2341_v50 = vpop.xlane.xlu0 %2340 }
 0xb5e   : > { %4066 = vpow2.f32 %v2365_v42  ;;  %v2355_v52 = vsub.f32 %v2269_v32, %v2341_v50 }
 0xb5f   : > { %4068 = vpow2.f32 %v2369_v40  ;;  %v2350_v0 = vpop.xlane.xlu1 %2349 }
 0xb60   : > { %v2367_v53 = vmul.f32 1.442695, %v2355_v52  ;;  %v2358_v10 = vsub.f32 %v5260_v62, %v2350_v0  ;;  %v3938_v52 = vld [vmem:[#allocation9] sm:$0xff]  }
 0xb61   : > { %v2347_v55 = vpop.xlane.xlu0 %2346 }
 0xb62   : > { %4070 = vpow2.f32 %v2367_v53  ;;  %v2357_v56 = vsub.f32 %v2320_v58, %v2347_v55  ;;  %v3939_v53 = vld [vmem:[#allocation9 + $0x8] sm:$0xff]  }
 0xb64   : > { %v4065_v59 = vpop.eup %4064  ;;  %v2371_v61 = vmul.f32 1.442695, %v2357_v56 }
 0xb65   : > { %v2381_v63 = vsel %vm816_vm3, %v4065_v59, 0.0 }
 0xb66   : > { %4072 = vpow2.f32 %v2371_v61  ;;  %2382 = vadd.xlane.f32.xlu0 %v2381_v63 }
 0xb68   : > { %v4067_v34 = vpop.eup %4066 }
 0xb69   : > { %v2384_v51 = vsel %vm816_vm3, %v4067_v34, 0.0  ;;  %v5275_v54 = vpop.eup %4068 }
 0xb6a   : > { %2385 = vadd.xlane.f32.xlu1 %v2384_v51  ;;  %v2390_v58 = vsel %vm816_vm3, %v5275_v54, 0.0 }
 0xb6c   : > { %v5277_v57 = vpop.eup %4070 }
 0xb6d   : > { %v2387_v32 = vsel %vm816_vm3, %v5277_v57, 0.0 }
 0xb6e   : > { %2388 = vadd.xlane.f32.xlu0 %v2387_v32  ;;  %2391 = vadd.xlane.f32.xlu1 %v2390_v58 }
 0xb70   : > { %v5283_v5 = vpop.eup %4072 }
 0xb71   : > { %v2393_v9 = vsel %vm816_vm3, %v5283_v5, 0.0 }
 0xb72   : > { %2394 = vadd.xlane.f32.xlu0 %v2393_v9 }
 0xb7f   : > { %2466 = vrot.lane.b32.xlu1 %v4910_v19, %s4482_s9  ;;  %v2373_v19 = vmul.f32 1.442695, %v2358_v10 }
 0xb81   : > { %4074 = vpow2.f32 %v2373_v19 }
 0xb83   : > { %2513 = vrot.lane.b32.xlu1 %v4918_v27, %s4482_s9 }
 0xb88   : > { %2419 = vrot.lane.b32.xlu0 %v4912_v21, %s4482_s9 }
 0xb8b   : > { %v5303_v21 = vpop.eup %4074 }
 0xb8c   : > { %1597 = vrot.lane.b32.xlu0 %v1589_v39, %s4483_s12  ;;  %v2396_v27 = vsel %vm816_vm3, %v5303_v21, 0.0 }
 0xb90   : > { %2106 = vrot.lane.b32.xlu0 %v2098_v6, %s4484_s22 }
 0xb94   : > { %1601 = vrot.lane.b32.xlu0 %v1591_v49, %s4483_s12 }
 0xba7   : > { %2397 = vadd.xlane.f32.xlu1 %v2396_v27 }
 0xbb8   : > { %2560 = vrot.lane.b32.xlu1 %v4916_v25, %s4482_s9  ;;  %s4380_s9 = scalar_lea.vmem %s4379_s25, 2048 }
 0xbbc   : > { %1599 = vrot.lane.b32.xlu1 %v1590_v44, %s4483_s12 }
 0xbbf   : > { %v2377_v36 = vpop.xlane.xlu0 %2376 }
 0xbc0   : > { %2108 = vrot.lane.b32.xlu1 %v2099_v17, %s4484_s22 }
 0xbc1   : > { %v2380_v38 = vpop.xlane.xlu1 %2379 }
 0xbc2   : > { %4076 = vrcp.f32 %v2380_v38 }
 0xbc3   : > { %4078 = vrcp.f32 %v2377_v36 }
 0xbc4   : > { %1603 = vrot.lane.b32.xlu1 %v1592_v4, %s4483_s12 }
 0xbcc   : > { %v4077_v44 = vpop.eup %4076 }
 0xbcd   : > { %v4079_v46 = vpop.eup %4078  ;;  %v2408_v60 = vmul.f32 %v4077_v44, %v5269_v23 }
 0xbce   : > { %v2407_v4 = vmul.f32 %v4079_v46, %v5265_v14 }
 0xbd0   : > { %v2415_v16 = vpack.c.bf16 %v2408_v60, %v2407_v4 }
 0xbf3   : > { %v2383_v39 = vpop.xlane.xlu0 %2382 }
 0xbf4   : > { %4080 = vrcp.f32 %v2383_v39 }
 0xbf7   : > { %v2386_v25 = vpop.xlane.xlu1 %2385 }
 0xbf8   : > { %4082 = vrcp.f32 %v2386_v25 }
 0xbfb   : > { %v2389_v41 = vpop.xlane.xlu0 %2388  ;;  %v2392_v43 = vpop.xlane.xlu1 %2391 }
 0xbfc   : > { %4084 = vrcp.f32 %v2389_v41 }
 0xbfd   : > { %4086 = vrcp.f32 %v2392_v43 }
 0xbfe   : > { %v4081_v1 = vpop.eup %4080 }
 0xbff   : > { %v2395_v48 = vpop.xlane.xlu0 %2394  ;;  %v2467_v49 = vpop.permute.xlu1 %2466  ;;  %v2409_v2 = vmul.f32 %v4081_v1, %v4065_v59  ;;  %v4141_v1 = vld [vmem:[%s4822_s17] sm:$0xff] }
 0xc00   : > { %3729 = vmatpush3.bf16.msra.mxu1 %v2467_v49  ;;  %4088 = vrcp.f32 %v2395_v48  ;;  %v4140_v48 = vld [vmem:[%s4822_s17 + $0x10] sm:$0xff] }
 0xc01   : > { %3740 = vmatprep.subr.bf16.mxu1 %v4470_v8 }
 0xc02   : > { %v4083_v3 = vpop.eup %4082 }
 0xc03   : > { %v2410_v6 = vmul.f32 %v4083_v3, %v4067_v34  ;;  %v2420_v13 = vpop.permute.xlu0 %2419  ;;  %v2514_v12 = vpop.permute.xlu1 %2513 }
 0xc04   : > { %3723 = vmatpush3.bf16.msra.mxu0 %v2420_v13 }
 0xc05   : > { %3734 = vmatprep.subr.bf16.mxu0 %v4470_v8  ;;  %v2416_v17 = vpack.c.bf16 %v2410_v6, %v2409_v2  ;;  %v4142_v2 = vld [vmem:[%s4822_s17 + $0x8] sm:$0xff] }
 0xc06   : > { %v4085_v62 = vpop.eup %4084 }
 0xc07   : > { %v4087_v11 = vpop.eup %4086  ;;  %v1598_v7 = vpop.permute.xlu0 %1597  ;;  %3725 = vmatmul.mubr.msk.bf16.vlgmr.msra.gmra.mrb[60].mxu0 %vm816_vm3, %v2415_v16  ;;  %3731 = vmatmul.mubr.msk.bf16.vlgmr.msra.gmra.mrb[60].mxu1 %vm816_vm3, %v2416_v17  ;;  %v2411_v14 = vmul.f32 %v4085_v62, %v5277_v57  ;;  %v4143_v16 = vld [vmem:[%s4822_s17 + $0x18] sm:$0xff] }
 0xc08   : > { %1610 = vst.msk [vmem:[#allocation2] sm:$0xff] %vm1609_vm4, %v1598_v7  ;;  %3735 = vmatpush3.bf16.msra.mxu0 %v2514_v12  ;;  %3736 = vmatprep.mubr.msk.bf16.mxu0 %vm4471_vm1, %v4470_v8  ;;  %v2412_v18 = vmul.f32 %v4087_v11, %v5275_v54 }
 0xc09   : > { %3742 = vmatprep.mubr.msk.bf16.mxu1 %vm4471_vm1, %v4470_v8  ;;  %3746 = vmatprep.subr.bf16.mxu0 %v3938_v52 }
 0xc0a   : > { %v2417_v28 = vpack.c.bf16 %v2412_v18, %v2411_v14  ;;  %v4089_v26 = vpop.eup %4088 }
 0xc0b   : > { %v2107_v23 = vpop.permute.xlu0 %2106  ;;  %v2413_v8 = vmul.f32 %v4089_v26, %v5283_v5 }
 0xc0c   : > { %2119 = vst.msk [vmem:[#allocation2] sm:$0xff] %vm2118_vm5, %v2107_v23 }
 0xc0f   : > { %v1602_v30 = vpop.permute.xlu0 %1601  ;;  %3737 = vmatmul.mubr.msk.bf16.vlgmr.msra.gmra.mrb[64].mxu0 %vm816_vm3, %v2417_v28  ;;  %v3940_v28 = vld [vmem:[#allocation12] sm:$0xff]  }
 0xc10   : > { %1612 = vst.msk [vmem:[#allocation2 + $0x10] sm:$0xff] %vm1609_vm4, %v1602_v30  ;;  %3747 = vmatpush3.bf16.msra.mxu0 %v3938_v52  ;;  %v3941_v30 = vld [vmem:[#allocation14] sm:$0xff]  }
 0xc11   : > { %3748 = vmatprep.subr.bf16.mxu0 %v3939_v53  ;;  %v4146_v52 = vld [vmem:[%s4822_s17 + $0x38] sm:$0xff] }
 0xc14   : > { %3749 = vmatpush3.bf16.msra.mxu0 %v3939_v53 }
 0xc15   : > { %3770 = vmatprep.subr.bf16.mxu0 %v3941_v30 }
 0xc34   : > { %v2398_v24 = vpop.xlane.xlu1 %2397 }
 0xc35   : > { %4090 = vrcp.f32 %v2398_v24  ;;  %v3942_v24 = vld [vmem:[#allocation12 + $0x8] sm:$0xff]  }
 0xc38   : > { %v2561_v31 = vpop.permute.xlu1 %2560 }
 0xc39   : > { %3741 = vmatpush3.bf16.msra.mxu1 %v2561_v31  ;;  %v3943_v31 = vld [vmem:[#allocation14 + $0x8] sm:$0xff]  }
 0xc3a   : > { %3758 = vmatprep.subr.bf16.mxu1 %v3940_v28 }
 0xc3c   : > { %v1600_v29 = vpop.permute.xlu1 %1599 }
 0xc3d   : > { %1611 = vst.msk [vmem:[#allocation2 + $0x8] sm:$0xff] %vm1609_vm4, %v1600_v29 }
 0xc3f   : > { %v4091_v33 = vpop.eup %4090 }
 0xc40   : > { %v2414_v37 = vmul.f32 %v4091_v33, %v5303_v21  ;;  %v2109_v40 = vpop.permute.xlu1 %2108  ;;  %v4144_v33 = vld [vmem:[%s4822_s17 + $0x30] sm:$0xff] }
 0xc41   : > { %2120 = vst.msk [vmem:[#allocation2 + $0x8] sm:$0xff] %vm2118_vm5, %v2109_v40 }
 0xc42   : > { %v2418_v42 = vpack.c.bf16 %v2414_v37, %v2413_v8  ;;  %v4145_v37 = vld [vmem:[%s4822_s17 + $0x20] sm:$0xff] }
 0xc44   : > { %3743 = vmatmul.mubr.msk.bf16.vlgmr.msra.gmra.mrb[64].mxu1 %vm816_vm3, %v2418_v42  ;;  %v1604_v50 = vpop.permute.xlu1 %1603 }
 0xc45   : > { %1613 = vst.msk [vmem:[#allocation2 + $0x18] sm:$0xff] %vm1609_vm4, %v1604_v50  ;;  %3759 = vmatpush3.bf16.msra.mxu1 %v3940_v28 }
 0xc46   : > { %3760 = vmatprep.subr.bf16.mxu1 %v3942_v24 }
 0xc49   : > { %3761 = vmatpush3.bf16.msra.mxu1 %v3942_v24 }
 0xcda   : > { %v2459_v55 = vpop.f32.mrb[60].mxu0  ;;  %v2506_v56 = vpop.f32.mrb[60].mxu1 }
 0xcdb   : > { %v3726_v59 = vpop.f32.mrb[61].mxu0  ;;  %v3732_v61 = vpop.f32.mrb[61].mxu1 }
 0xcdc   : > { %v2462_v63 = vpop.f32.mrb[62].mxu0  ;;  %v2509_v34 = vpop.f32.mrb[62].mxu1 }
 0xcdd   : > { %v2607_v51 = vpack.c.bf16 %v2462_v63, %v2459_v55  ;;  %v2608_v54 = vpack.c.bf16 %v2509_v34, %v2506_v56  ;;  %v3727_v57 = vpop.f32.mrb[63].mxu0  ;;  %v3733_v32 = vpop.f32.mrb[63].mxu1  ;;  %v4147_v55 = vld [vmem:[%s4822_s17 + $0x28] sm:$0xff]  ;;  %s421_s17 = scalar_lea.vmem [#allocation17], %s3356_s10 }
 0xcde   : > { %s3202_s10 = sshll.u32 %s421_s17, 4  ;;  %s5450_s10 = int_to_ptr.vmem [resolvable:$true] %s3202_s10 }
 0xcdf   : > { %2615 = vrot.lane.b32.xlu0 %v2607_v51, %s4485_s18  ;;  %2617 = vrot.lane.b32.xlu1 %v2608_v54, %s4485_s18  ;;  %s4374_s24 = scalar_lea.vmem %s5450_s10, 1024  ;;  %p4381_p2 = scmp.lt.s32.totalorder %s5450_s10, %s4379_s25 }
 0xce0   : > { %p4375_p4 = scmp.ne.s32.totalorder %s5450_s10, %s4374_s24  ;;  %p4382_p8 = scmp.lt.s32.totalorder %s4380_s9, %s4374_s24 }
 0xce2   : > { %v2553_v58 = vpop.f32.mrb[64].mxu0  ;;  %p4376_p13 = pnand %p4375_p4, %p5528_p1  ;;  %p4383_p6 = por %p4382_p8, %p4381_p2 }
 0xce3   : > { %2110 = vrot.lane.b32.xlu0 %v2100_v22, %s4484_s22  ;;  %v3738_v5 = vpop.f32.mrb[65].mxu0  ;;  %2112 = vrot.lane.b32.xlu1 %v2101_v47, %s4484_s22 }
 0xce4   : > { %v2556_v9 = vpop.f32.mrb[66].mxu0  ;;  %p4377_p0 = pneg %p4376_p13 }
 0xce5   : > { %v2609_v0 = vpack.c.bf16 %v2556_v9, %v2553_v58  ;;  %v3739_v10 = vpop.f32.mrb[67].mxu0 }
 0xce6   : > { %p4384_p11 = pnand %p4383_p6, %p4377_p0 }
 0xce7   : > { %2619 = vrot.lane.b32.xlu0 %v2609_v0, %s4485_s18 }
 0xd17   : > { %v2600_v19 = vpop.f32.mrb[64].mxu1 }
 0xd18   : > { %v3744_v21 = vpop.f32.mrb[65].mxu1 }
 0xd19   : > { %v2603_v27 = vpop.f32.mrb[66].mxu1 }
 0xd1a   : > { %v2610_v36 = vpack.c.bf16 %v2603_v27, %v2600_v19  ;;  %v3745_v38 = vpop.f32.mrb[67].mxu1 }
 0xd1c   : > { %2621 = vrot.lane.b32.xlu1 %v2610_v36, %s4485_s18 }
 0xd51   : > { %v2616_v39 = vpop.permute.xlu0 %2615  ;;  %v2618_v15 = vpop.permute.xlu1 %2617 }
 0xd52   : > { %2628 = vst.msk [vmem:[#allocation2] sm:$0xff] %vm2627_vm6, %v2616_v39  ;;  %2629 = vst.msk [vmem:[#allocation2 + $0x8] sm:$0xff] %vm2627_vm6, %v2618_v15 }
 0xd55   : > { %v2111_v20 = vpop.permute.xlu0 %2110  ;;  %v2113_v22 = vpop.permute.xlu1 %2112 }
 0xd56   : > { %2121 = vst.msk [vmem:[#allocation2 + $0x10] sm:$0xff] %vm2118_vm5, %v2111_v20  ;;  %2122 = vst.msk [vmem:[#allocation2 + $0x18] sm:$0xff] %vm2118_vm5, %v2113_v22 }
 0xd59   : > { %v2620_v35 = vpop.permute.xlu0 %2619  ;;  %v2632_v45 = vld [vmem:[#allocation2] sm:$0xff]  ;;  %v2633_v47 = vld [vmem:[#allocation2 + $0x8] sm:$0xff] }
 0xd5a   : > { %2630 = vst.msk [vmem:[#allocation2 + $0x10] sm:$0xff] %vm2627_vm6, %v2620_v35  ;;  %3750 = vmatprep.mubr.msk.bf16.mxu0 %vm441_vm0, %v2632_v45  ;;  %v3410_v45 = vld [vmem:[#allocation11] ss:$0 sm:$0xff] }
 0xd5b   : > { %3751 = vmatmul.mubr.msk.bf16.vlgmr.msra.gmra.mrb[68].mxu0 %vm441_vm0, %v2633_v47 }
 0xd5c   : > { %3771 = vmatpush3.bf16.msra.mxu0 %v3941_v30 }
 0xd5d   : > { %3772 = vmatprep.subr.bf16.mxu0 %v3943_v31 }
 0xd60   : > { %3773 = vmatpush3.bf16.msra.mxu0 %v3943_v31 }
 0xd61   : > { %v2634_v25 = vld [vmem:[#allocation2 + $0x10] sm:$0xff] }
 0xd62   : > { %3754 = vmatprep.mubr.msk.bf16.mxu0 %vm441_vm0, %v2634_v25 }
 0xd8e   : > { %v2622_v41 = vpop.permute.xlu1 %2621 }
 0xd8f   : > { %2631 = vst.msk [vmem:[#allocation2 + $0x18] sm:$0xff] %vm2627_vm6, %v2622_v41 }
 0xd96   : > { %v2635_v43 = vld [vmem:[#allocation2 + $0x18] sm:$0xff] }
 0xd97   : > { %3755 = vmatmul.mubr.msk.bf16.gmra.mrb[72].mxu0 %vm441_vm0, %v2635_v43 }
 0xe2e   : > { %v3752_v44 = vpop.f32.mrb[68].mxu0 }
 0xe2f   : > { %v2698_v46 = vpop.f32.mrb[69].mxu0  ;;  %v5361_v49 = vadd.f32 %v4140_v48, %v3752_v44 }
 0xe30   : > { %v5364_v60 = vadd.f32 %v4141_v1, %v2698_v46  ;;  %v3753_v3 = vpop.f32.mrb[70].mxu0 }
 0xe31   : > { %v2701_v4 = vpop.f32.mrb[71].mxu0  ;;  %v5372_v17 = vadd.f32 %v4143_v16, %v3753_v3  ;;  %v2739_v12 = vmul.f32 %v5361_v49, %v5361_v49 }
 0xe32   : > { %v5367_v6 = vadd.f32 %v4142_v2, %v2701_v4  ;;  %v2737_v13 = vmul.f32 %v5364_v60, %v5364_v60 }
 0xe33   : > { %v2751_v14 = vsel %vm441_vm0, %v2739_v12, 0.0  ;;  %v2740_v18 = vmul.f32 %v5372_v17, %v5372_v17 }
 0xe34   : > { %v2745_v62 = vsel %vm441_vm0, %v2737_v13, 0.0  ;;  %v2738_v11 = vmul.f32 %v5367_v6, %v5367_v6 }
 0xe35   : > { %2746 = vadd.xlane.f32.xlu0 %v2745_v62  ;;  %v2754_v23 = vsel %vm441_vm0, %v2740_v18, 0.0 }
 0xe36   : > { %v2748_v7 = vsel %vm441_vm0, %v2738_v11, 0.0 }
 0xe37   : > { %2749 = vadd.xlane.f32.xlu1 %v2748_v7 }
 0xe39   : > { %2752 = vadd.xlane.f32.xlu0 %v2751_v14 }
 0xe3d   : > { %2755 = vadd.xlane.f32.xlu0 %v2754_v23 }
 0xe6a   : > { %v3756_v29 = vpop.f32.mrb[72].mxu0 }
 0xe6b   : > { %v2714_v26 = vpop.f32.mrb[73].mxu0  ;;  %v5385_v8 = vadd.f32 %v4144_v33, %v3756_v29 }
 0xe6c   : > { %v5388_v40 = vadd.f32 %v4145_v37, %v2714_v26  ;;  %v3757_v42 = vpop.f32.mrb[74].mxu0 }
 0xe6d   : > { %v2717_v50 = vpop.f32.mrb[75].mxu0  ;;  %v5391_v53 = vadd.f32 %v4146_v52, %v3757_v42  ;;  %v2743_v34 = vmul.f32 %v5385_v8, %v5385_v8 }
 0xe6e   : > { %v5394_v56 = vadd.f32 %v4147_v55, %v2717_v50  ;;  %v2741_v59 = vmul.f32 %v5388_v40, %v5388_v40 }
 0xe6f   : > { %v2744_v54 = vmul.f32 %v5391_v53, %v5391_v53  ;;  %v2763_v57 = vsel %vm441_vm0, %v2743_v34, 0.0 }
 0xe70   : > { %v2757_v61 = vsel %vm441_vm0, %v2741_v59, 0.0  ;;  %v2742_v63 = vmul.f32 %v5394_v56, %v5394_v56 }
 0xe71   : > { %2758 = vadd.xlane.f32.xlu0 %v2757_v61  ;;  %v2766_v32 = vsel %vm441_vm0, %v2744_v54, 0.0  ;;  %v3944_v54 = vld [vmem:[#allocation15] sm:$0xff]  }
 0xe72   : > { %v2760_v51 = vsel %vm441_vm0, %v2742_v63, 0.0  ;;  %3782 = vmatprep.subr.bf16.mxu1 %v3944_v54 }
 0xe73   : > { %2761 = vadd.xlane.f32.xlu1 %v2760_v51 }
 0xe75   : > { %2764 = vadd.xlane.f32.xlu0 %v2763_v57  ;;  %v3945_v57 = vld [vmem:[#allocation15 + $0x8] sm:$0xff]  }
 0xe77   : > { %2767 = vadd.xlane.f32.xlu1 %v2766_v32  ;;  %v3946_v32 = vld [vmem:[#allocation15 + $0x10] sm:$0xff]  }
 0xec2   : > { %v2747_v58 = vpop.xlane.xlu0 %2746 }
 0xec3   : > { %v2769_v5 = vmul.f32 0.03125, %v2747_v58  ;;  %v3947_v58 = vld [vmem:[#allocation15 + $0x18] sm:$0xff]  }
 0xec4   : > { %v2750_v9 = vpop.xlane.xlu1 %2749 }
 0xec5   : > { %v2777_v0 = vadd.f32 1e-05, %v2769_v5  ;;  %v2770_v10 = vmul.f32 0.03125, %v2750_v9 }
 0xec6   : > { %v2753_v19 = vpop.xlane.xlu0 %2752 }
 0xec7   : > { %4092 = vrsqrt.f32 %v2777_v0  ;;  %v2778_v21 = vadd.f32 1e-05, %v2770_v10  ;;  %v2771_v27 = vmul.f32 0.03125, %v2753_v19 }
 0xec9   : > { %4094 = vrsqrt.f32 %v2778_v21  ;;  %v2779_v36 = vadd.f32 1e-05, %v2771_v27 }
 0xeca   : > { %v2756_v38 = vpop.xlane.xlu0 %2755 }
 0xecb   : > { %4096 = vrsqrt.f32 %v2779_v36  ;;  %v2772_v39 = vmul.f32 0.03125, %v2756_v38 }
 0xecd   : > { %v2780_v15 = vadd.f32 1e-05, %v2772_v39 }
 0xecf   : > { %4098 = vrsqrt.f32 %v2780_v15 }
 0xed1   : > { %v4093_v20 = vpop.eup %4092 }
 0xed2   : > { %v2793_v22 = vmul.f32 %v4093_v20, %v5364_v60 }
 0xed3   : > { %v4095_v35 = vpop.eup %4094 }
 0xed4   : > { %v2794_v47 = vmul.f32 %v4095_v35, %v5367_v6  ;;  %v2808_v41 = vmul.f32 %v3410_v45, %v2793_v22 }
 0xed5   : > { %v4097_v25 = vpop.eup %4096 }
 0xed6   : > { %v2809_v43 = vmul.f32 %v3410_v45, %v2794_v47  ;;  %v2795_v44 = vmul.f32 %v4097_v25, %v5361_v49 }
 0xed8   : > { %v2816_v46 = vpack.c.bf16 %v2809_v43, %v2808_v41  ;;  %v2810_v3 = vmul.f32 %v3410_v45, %v2795_v44 }
 0xed9   : > { %v4099_v48 = vpop.eup %4098 }
 0xeda   : > { %v2796_v1 = vmul.f32 %v4099_v48, %v5372_v17  ;;  %3762 = vmatprep.mubr.msk.bf16.mxu1 %vm441_vm0, %v2816_v46  ;;  %3774 = vmatprep.mubr.msk.bf16.mxu0 %vm441_vm0, %v2816_v46 }
 0xedc   : > { %v2811_v4 = vmul.f32 %v3410_v45, %v2796_v1 }
 0xede   : > { %v2817_v2 = vpack.c.bf16 %v2811_v4, %v2810_v3 }
 0xee0   : > { %3763 = vmatmul.mubr.msk.bf16.vlgmr.msra.gmra.mrb[68].mxu1 %vm441_vm0, %v2817_v2  ;;  %3775 = vmatmul.mubr.msk.bf16.vlgmr.msra.gmra.mrb[76].mxu0 %vm441_vm0, %v2817_v2 }
 0xee1   : > { %3783 = vmatpush3.bf16.msra.mxu1 %v3944_v54 }
 0xee2   : > { %3784 = vmatprep.subr.bf16.mxu1 %v3945_v57 }
 0xee5   : > { %3785 = vmatpush3.bf16.msra.mxu1 %v3945_v57 }
 0xee6   : > { %3786 = vmatprep.subr.bf16.mxu1 %v3946_v32 }
 0xee9   : > { %3787 = vmatpush3.bf16.msra.mxu1 %v3946_v32 }
 0xeea   : > { %3788 = vmatprep.subr.bf16.mxu1 %v3947_v58 }
 0xeed   : > { %3789 = vmatpush3.bf16.msra.mxu1 %v3947_v58 }
 0xefe   : > { %v2759_v13 = vpop.xlane.xlu0 %2758 }
 0xeff   : > { %v2773_v16 = vmul.f32 0.03125, %v2759_v13 }
 0xf00   : > { %v2762_v62 = vpop.xlane.xlu1 %2761 }
 0xf01   : > { %v2781_v11 = vadd.f32 1e-05, %v2773_v16  ;;  %v2774_v12 = vmul.f32 0.03125, %v2762_v62 }
 0xf02   : > { %v2765_v7 = vpop.xlane.xlu0 %2764 }
 0xf03   : > { %4100 = vrsqrt.f32 %v2781_v11  ;;  %v2782_v14 = vadd.f32 1e-05, %v2774_v12  ;;  %v2775_v18 = vmul.f32 0.03125, %v2765_v7 }
 0xf04   : > { %v2768_v23 = vpop.xlane.xlu1 %2767 }
 0xf05   : > { %4102 = vrsqrt.f32 %v2782_v14  ;;  %v2783_v28 = vadd.f32 1e-05, %v2775_v18  ;;  %v2776_v30 = vmul.f32 0.03125, %v2768_v23 }
 0xf07   : > { %4104 = vrsqrt.f32 %v2783_v28  ;;  %v2784_v24 = vadd.f32 1e-05, %v2776_v30 }
 0xf09   : > { %4106 = vrsqrt.f32 %v2784_v24 }
 0xf0d   : > { %v4101_v31 = vpop.eup %4100 }
 0xf0e   : > { %v2797_v29 = vmul.f32 %v4101_v31, %v5388_v40 }
 0xf0f   : > { %v4103_v26 = vpop.eup %4102 }
 0xf10   : > { %v2798_v33 = vmul.f32 %v4103_v26, %v5394_v56  ;;  %v2812_v42 = vmul.f32 %v3410_v45, %v2797_v29 }
 0xf11   : > { %v4105_v37 = vpop.eup %4104 }
 0xf12   : > { %v2813_v50 = vmul.f32 %v3410_v45, %v2798_v33  ;;  %v2799_v52 = vmul.f32 %v4105_v37, %v5385_v8 }
 0xf13   : > { %v4107_v55 = vpop.eup %4106 }
 0xf14   : > { %v2818_v59 = vpack.c.bf16 %v2813_v50, %v2812_v42  ;;  %v2800_v61 = vmul.f32 %v4107_v55, %v5391_v53  ;;  %v2814_v63 = vmul.f32 %v3410_v45, %v2799_v52 }
 0xf16   : > { %3766 = vmatprep.mubr.msk.bf16.mxu1 %vm441_vm0, %v2818_v59  ;;  %3778 = vmatprep.mubr.msk.bf16.mxu0 %vm441_vm0, %v2818_v59  ;;  %v2815_v34 = vmul.f32 %v3410_v45, %v2800_v61 }
 0xf18   : > { %v2819_v51 = vpack.c.bf16 %v2815_v34, %v2814_v63 }
 0xf1a   : > { %3767 = vmatmul.mubr.msk.bf16.gmra.mrb[72].mxu1 %vm441_vm0, %v2819_v51  ;;  %3779 = vmatmul.mubr.msk.bf16.gmra.mrb[80].mxu0 %vm441_vm0, %v2819_v51 }
 0xfb3   : > { %v3764_v5 = vpop.f32.mrb[68].mxu1  ;;  %v3776_v9 = vpop.f32.mrb[76].mxu0 }
 0xfb4   : > { %v3425_v0 = vmul.f32 -1.442695, %v3776_v9  ;;  %v2882_v10 = vpop.f32.mrb[69].mxu1  ;;  %v2963_v19 = vpop.f32.mrb[77].mxu0 }
 0xfb5   : > { %v3423_v21 = vmul.f32 -1.442695, %v2963_v19  ;;  %v3765_v27 = vpop.f32.mrb[70].mxu1  ;;  %v3777_v36 = vpop.f32.mrb[78].mxu0 }
 0xfb6   : > { %4108 = vpow2.f32 %v3425_v0  ;;  %v3426_v38 = vmul.f32 -1.442695, %v3777_v36  ;;  %v2885_v39 = vpop.f32.mrb[71].mxu1  ;;  %v2966_v15 = vpop.f32.mrb[79].mxu0 }
 0xfb7   : > { %4110 = vpow2.f32 %v3423_v21  ;;  %v3424_v20 = vmul.f32 -1.442695, %v2966_v15 }
 0xfb8   : > { %4112 = vpow2.f32 %v3426_v38 }
 0xfb9   : > { %4114 = vpow2.f32 %v3424_v20 }
 0xfc0   : > { %v4109_v22 = vpop.eup %4108 }
 0xfc1   : > { %v4111_v35 = vpop.eup %4110  ;;  %v3020_v45 = vadd.f32 1.0, %v4109_v22 }
 0xfc2   : > { %v4113_v47 = vpop.eup %4112  ;;  %v3018_v25 = vadd.f32 1.0, %v4111_v35 }
 0xfc3   : > { %v4115_v41 = vpop.eup %4114  ;;  %4116 = vrcp.f32 %v3020_v45  ;;  %v3021_v43 = vadd.f32 1.0, %v4113_v47 }
 0xfc4   : > { %4118 = vrcp.f32 %v3018_v25  ;;  %v3019_v44 = vadd.f32 1.0, %v4115_v41 }
 0xfc5   : > { %4120 = vrcp.f32 %v3021_v43 }
 0xfc6   : > { %4122 = vrcp.f32 %v3019_v44 }
 0xfcd   : > { %v4117_v46 = vpop.eup %4116 }
 0xfce   : > { %v4119_v48 = vpop.eup %4118  ;;  %v3044_v1 = vmul.f32 %v4117_v46, %v3776_v9 }
 0xfcf   : > { %v4121_v3 = vpop.eup %4120  ;;  %v3042_v4 = vmul.f32 %v4119_v48, %v2963_v19 }
 0xfd0   : > { %v4123_v2 = vpop.eup %4122  ;;  %v3052_v13 = vmul.f32 %v3764_v5, %v3044_v1  ;;  %v3045_v16 = vmul.f32 %v4121_v3, %v3777_v36 }
 0xfd1   : > { %v3050_v62 = vmul.f32 %v3042_v4, %v2882_v10  ;;  %v3043_v11 = vmul.f32 %v4123_v2, %v2966_v15 }
 0xfd2   : > { %v3053_v12 = vmul.f32 %v3765_v27, %v3045_v16 }
 0xfd3   : > { %v3051_v7 = vmul.f32 %v3043_v11, %v2885_v39 }
 0xfd4   : > { %v3059_v14 = vpack.c.bf16 %v3053_v12, %v3052_v13 }
 0xfd5   : > { %v3058_v18 = vpack.c.bf16 %v3051_v7, %v3050_v62 }
 0xfd7   : > { %3790 = vmatprep.mubr.msk.bf16.mxu1 %vm3094_vm7, %v3058_v18 }
 0xfd8   : > { %3791 = vmatmul.mubr.msk.bf16.vlgmr.msra.gmra.mrb[76].mxu1 %vm3094_vm7, %v3059_v14 }
 0xfed   : > { %v3768_v23 = vpop.f32.mrb[72].mxu1  ;;  %v3780_v28 = vpop.f32.mrb[80].mxu0 }
 0xfee   : > { %v3429_v30 = vmul.f32 -1.442695, %v3780_v28  ;;  %v2898_v24 = vpop.f32.mrb[73].mxu1  ;;  %v2979_v31 = vpop.f32.mrb[81].mxu0 }
 0xfef   : > { %v3427_v29 = vmul.f32 -1.442695, %v2979_v31  ;;  %v3769_v26 = vpop.f32.mrb[74].mxu1  ;;  %v3781_v33 = vpop.f32.mrb[82].mxu0 }
 0xff0   : > { %4124 = vpow2.f32 %v3429_v30  ;;  %v3430_v37 = vmul.f32 -1.442695, %v3781_v33  ;;  %v2901_v42 = vpop.f32.mrb[75].mxu1  ;;  %v2982_v50 = vpop.f32.mrb[83].mxu0 }
 0xff1   : > { %4126 = vpow2.f32 %v3427_v29  ;;  %v3428_v52 = vmul.f32 -1.442695, %v2982_v50 }
 0xff2   : > { %4128 = vpow2.f32 %v3430_v37 }
 0xff3   : > { %4130 = vpow2.f32 %v3428_v52 }
 0xffa   : > { %v4125_v55 = vpop.eup %4124 }
 0xffb   : > { %v4127_v59 = vpop.eup %4126  ;;  %v3024_v61 = vadd.f32 1.0, %v4125_v55 }
 0xffc   : > { %v4129_v63 = vpop.eup %4128  ;;  %v3022_v34 = vadd.f32 1.0, %v4127_v59 }
 0xffd   : > { %v4131_v51 = vpop.eup %4130  ;;  %4132 = vrcp.f32 %v3024_v61  ;;  %v3025_v54 = vadd.f32 1.0, %v4129_v63 }
 0xffe   : > { %4134 = vrcp.f32 %v3022_v34  ;;  %v3023_v57 = vadd.f32 1.0, %v4131_v51 }
 0xfff   : > { %4136 = vrcp.f32 %v3025_v54 }
0x1000   : > { %4138 = vrcp.f32 %v3023_v57 }
0x1007   : > { %v4133_v32 = vpop.eup %4132 }
0x1008   : > { %v4135_v58 = vpop.eup %4134  ;;  %v3048_v5 = vmul.f32 %v4133_v32, %v3780_v28 }
0x1009   : > { %v4137_v9 = vpop.eup %4136  ;;  %v3046_v0 = vmul.f32 %v4135_v58, %v2979_v31 }
0x100a   : > { %v4139_v10 = vpop.eup %4138  ;;  %v3056_v19 = vmul.f32 %v3768_v23, %v3048_v5  ;;  %v3049_v21 = vmul.f32 %v4137_v9, %v3781_v33 }
0x100b   : > { %v3054_v27 = vmul.f32 %v3046_v0, %v2898_v24  ;;  %v3047_v36 = vmul.f32 %v4139_v10, %v2982_v50 }
0x100c   : > { %v3057_v38 = vmul.f32 %v3769_v26, %v3049_v21 }
0x100d   : > { %v3055_v39 = vmul.f32 %v3047_v36, %v2901_v42 }
0x100e   : > { %v3061_v15 = vpack.c.bf16 %v3057_v38, %v3056_v19 }
0x100f   : > { %v3060_v20 = vpack.c.bf16 %v3055_v39, %v3054_v27 }
0x1011   : > { %3794 = vmatprep.mubr.msk.bf16.mxu1 %vm3094_vm7, %v3060_v20 }
0x1012   : > { %3795 = vmatmul.mubr.msk.bf16.gmra.mrb[80].mxu1 %vm3094_vm7, %v3061_v15 }
0x10ab   : > { %v3792_v22 = vpop.f32.mrb[76].mxu1 }
0x10ac   : > { %v3174_v35 = vadd.f32 %v3792_v22, %v5361_v49  ;;  %v3141_v45 = vpop.f32.mrb[77].mxu1 }
0x10ad   : > { %v3172_v47 = vadd.f32 %v3141_v45, %v5364_v60  ;;  %v3793_v25 = vpop.f32.mrb[78].mxu1 }
0x10ae   : > { %3182 = vst.msk [vmem:[%s421_s17 + $0x10] sm:$0xff] %vm441_vm0, %v3174_v35  ;;  %v3175_v41 = vadd.f32 %v3793_v25, %v5372_v17  ;;  %v3144_v43 = vpop.f32.mrb[79].mxu1 }
0x10af   : > { %3180 = vst.msk [vmem:[%s421_s17] sm:$0xff] %vm441_vm0, %v3172_v47  ;;  %v3173_v44 = vadd.f32 %v3144_v43, %v5367_v6 }
0x10b0   : > { %3183 = vst.msk [vmem:[%s421_s17 + $0x18] sm:$0xff] %vm441_vm0, %v3175_v41 }
0x10b1   : > { %3181 = vst.msk [vmem:[%s421_s17 + $0x8] sm:$0xff] %vm441_vm0, %v3173_v44 }
0x10e5   : > { %v3796_v49 = vpop.f32.mrb[80].mxu1 }
0x10e6   : > { %v3178_v60 = vadd.f32 %v3796_v49, %v5385_v8  ;;  %v3157_v46 = vpop.f32.mrb[81].mxu1 }
0x10e7   : > { %v3176_v48 = vadd.f32 %v3157_v46, %v5388_v40  ;;  %v3797_v17 = vpop.f32.mrb[82].mxu1 }
0x10e8   : > { %3186 = vst.msk [vmem:[%s421_s17 + $0x30] sm:$0xff] %vm441_vm0, %v3178_v60  ;;  %v3179_v1 = vadd.f32 %v3797_v17, %v5391_v53  ;;  %v3160_v6 = vpop.f32.mrb[83].mxu1 }
0x10e9   : > { %3184 = vst.msk [vmem:[%s421_s17 + $0x20] sm:$0xff] %vm441_vm0, %v3176_v48  ;;  %v3177_v8 = vadd.f32 %v3160_v6, %v5394_v56 }
0x10ea   : > { %3187 = vst.msk [vmem:[%s421_s17 + $0x38] sm:$0xff] %vm441_vm0, %v3179_v1 }
0x10eb   : > { %3185 = vst.msk [vmem:[%s421_s17 + $0x28] sm:$0xff] %vm441_vm0, %v3177_v8 }
0x10ec   : > { %4387 = shalt.err (!%p4384_p11)
}
0x10ed   : > { %s4388_s22 = scalar_lea.hbm %s5446_s13, 1024  ;;  %s4392_s16 = scalar_lea.hbm %s5505_s8, 2048 }
0x10ee   : > { %p4389_p12 = scmp.ne.s32.totalorder %s5446_s13, %s4388_s22  ;;  %p4393_p9 = scmp.lt.u32.totalorder %s5446_s13, %s5505_s8 }
0x10ef   : > { %p4394_p7 = scmp.lt.u32.totalorder %s4392_s16, %s4388_s22  ;;  %p4396_p4 = scmp.lt.u32.totalorder %s4388_s22, %s5446_s13 }
0x10f0   : > { %p4390_p3 = pnand %p4389_p12, %p5528_p1 }
0x10f1   : > { %p4395_p10 = por %p4394_p7, %p4393_p9 }
0x10f2   : > { %p4391_p5 = pneg %p4390_p3 }
0x10f3   : > { %p4397_p13 = por %p4396_p4, %p4395_p10 }
0x10f5   : > { %p4398_p0 = pnand %p4397_p13, %p4391_p5 }
0x10f7   : > { %4401 = shalt.err (!%p4398_p0)
}
0x10f8   : > { %s4487_s24 = smov 128  }
0x10f9   : > { %3828 = dma.vmem_to_hbm [thread:$0]  (%p5528_p1), %s5450_s10, 1024, %s5446_s13, %s3189_s11, %s4487_s24, %s4487_s24, %s4483_s12  }
0x10fa PF: > { %s3217_s1 = sand.u32 1, %s4444_s27   ;;  %p5529_p2 = scmp.ne.s32.totalorder %s5517_s21, 0 }
0x10fb   : > { %p5530_p8 = scmp.ge.s32.totalorder %s4456_s30, 2  ;;  %s3218_s25 = scalar_lea.sflag [#allocation5], %s3217_s1 }
0x10fd   : > { %p3857_p6 = pnand %p5530_p8, %p5529_p2 }
0x10ff   : > { %4439 = dma.done.wait (!%p3857_p6), %s3218_s25, 1024  }
0x1100   : > { %4441 = vsyncadd (!%p3857_p6), %s3218_s25, 4294966272  ;;  %p25_p11 = scmp.ge.s32.totalorder %s4743_s23, 4   ;;  %s5531_s27 = smov %s4448_s28 }
0x1101   : > { %s5532_s28 = smov %s4452_s29  ;;  %s5533_s29 = smov %s4755_s19 }
0x1102   : > { %s5534_s30 = smov %s4743_s23  ;;  %27 = sbr.rel (!%p25_p11) target bundleno = 11 (0xb), region = 125 }
0x1109   :  { %3223 = vsyncpa [#allocation4], 1 }
0x110a   :  { %3225 = vsyncpa [#allocation4 + $0x1], 1 }
0x110b   :  { %3226 = vsyncpa [#allocation7], 1 }
0x110c   :  { %3227 = vsyncpa [#allocation10], 1 }
0x110d   :  { %3228 = vsyncpa [#allocation13], 1 }
0x110e   :  { %3229 = vsyncpa [#allocation16], 1 }
0x110f   :  { %3230 = vsyncpa [#allocation5], 1 }
0x1110   :  { %3232 = vsyncpa [#allocation5 + $0x1], 1 }

</bundles_post_ra>
